<compile_context>
chip_gen: v6e
topology: v6e:2x2x1
jax: 0.10.0
libtpu: 0.0.40
codegen_flags: <defaults>
</compile_context>

<pallas_src>
import jax
import jax.numpy as jnp
from jax import lax
from jax.experimental import pallas as pl
from jax.experimental.pallas import tpu as pltpu

LANE = 128  # TPU lane width; every feature group is padded to a multiple of this


def _rup(x, m):
    return ((x + m - 1) // m) * m


def _silu(x):
    return x * jax.nn.sigmoid(x)


def _mxu(x, w):
    """MXU matmul: bf16 operands, f32 accumulation (native MXU dtype on v5e/v6e/v7x).

    Weights are pre-cast to bf16 in the wrapper, so the astype on `w` is a
    trace-time no-op for them; only in-kernel f32 activations pick up a convert.
    """
    return jnp.dot(x.astype(jnp.bfloat16), w.astype(jnp.bfloat16),
                   preferred_element_type=jnp.float32)


# -----------------------------------------------------------------------------
# Pallas kernel: whole InteractionBlock forward (small graph fits in VMEM).
# -----------------------------------------------------------------------------
def interaction_kernel(edge_ref, angf_ref, srcc_ref, tgtc_ref, tgtr_ref,
                       waexp_ref, wedge_ref, bedge_ref, wbil_ref,
                       wb_ref, bb_ref, wskip_ref, bskip_ref,
                       waft_ref, baft_ref, out_ref):
    bf16 = jnp.bfloat16

    E = edge_ref.shape[0]          # (padded) edge count
    A = angf_ref.shape[0]          # (padded) angle count
    Hp = wskip_ref.shape[0]        # hidden dim padded to 128 lanes
    Minp = out_ref.shape[1]        # message dim padded to 128 lanes
    B = wbil_ref.shape[0] // Hp    # bilinear dim

    edge = edge_ref[...]           # [E, Minp+Rp] = [message | dist], lane-aligned slabs
    msg = edge[:, 0:Minp]          # f32 message slab (padded lanes zero) for the skip add

    # ---- fused edge projections: ONE wide matmul; each output segment starts
    # at a 128-lane boundary so the slices are whole-vreg views ----
    proj = _mxu(edge, wedge_ref[...]) + bedge_ref[...]            # [E, 3*Hp]
    sm_e = proj[:, 0:Hp]                                          # linear_source_message(message)
    tmsg = proj[:, Hp:2 * Hp]                                     # linear_target_message(message)
    d = proj[:, 2 * Hp:3 * Hp]                                    # linear_distance(distance_rep)

    # ---- gathers of per-angle rows via one-hot matmuls, natural [A, E] orientation ----
    # TODO(synk): replace with scalar-prefetch / DMA gathers + sorted segment
    # scatter once E/A are tiled for realistic graph sizes.
    col = lax.broadcasted_iota(jnp.int32, (A, E), 1)
    oh_src = (col == srcc_ref[...]).astype(bf16)                  # [A, E]
    oh_tgt = (col == tgtc_ref[...]).astype(bf16)                  # [A, E]
    sm = _mxu(oh_src, sm_e) * _mxu(oh_tgt, d)                     # sm_e[src] * d[tgt]  [A, Hp]

    # ---- bilinear contraction as a single K = B*Hp matmul ----
    # The angle projection arrives block-broadcast over the Hp slots
    # (wa_exp built in the wrapper): a_exp[n, b*Hp + h] == a[n, b].
    a_exp = _mxu(angf_ref[...], waexp_ref[...])                   # [A, B*Hp]
    scaled = a_exp * jnp.tile(sm, (1, B))                         # [A, B*Hp] (one lane tile + VPU mul)
    bil = _mxu(scaled, wbil_ref[...])                             # [A, Hp]

    # ---- scatter_add over target edges: one-hot built natively in [E, A]
    # orientation so the contraction is a plain matmul (no transposed operand) ----
    row = lax.broadcasted_iota(jnp.int32, (E, A), 0)
    oh_tgt_t = (row == tgtr_ref[...]).astype(bf16)                # [E, A]
    agg = _mxu(oh_tgt_t, bil)                                     # [E, Hp]

    x = agg + tmsg                                                # [E, Hp]

    # ---- residual layers before skip (1-2 layers: static unroll is fine) ----
    for l in range(wb_ref.shape[0] // 2):
        h = _silu(_mxu(x, wb_ref[2 * l]) + bb_ref[2 * l:2 * l + 1, :])
        h = _silu(_mxu(h, wb_ref[2 * l + 1]) + bb_ref[2 * l + 1:2 * l + 2, :])
        x = x + h

    # ---- skip connection ----
    x = _silu(_mxu(x, wskip_ref[...]) + bskip_ref[...]) + msg     # [E, Minp]

    # ---- residual layers after skip ----
    for l in range(waft_ref.shape[0] // 2):
        h = _silu(_mxu(x, waft_ref[2 * l]) + baft_ref[2 * l:2 * l + 1, :])
        h = _silu(_mxu(h, waft_ref[2 * l + 1]) + baft_ref[2 * l + 1:2 * l + 2, :])
        x = x + h

    out_ref[...] = x.astype(out_ref.dtype)                        # lane-dense [E, Minp] store


# -----------------------------------------------------------------------------
# Wrapper: parameter layout plumbing (padding, fusion, bf16 pre-cast) + pallas_call.
# -----------------------------------------------------------------------------
def interaction_block(dist, angle, message, angle_index, params):
    f32, bf16 = jnp.float32, jnp.bfloat16
    E, R = dist.shape
    A = angle.shape[0]
    Min = message.shape[1]
    H = params["Wd"].shape[0]
    B = params["Wa"].shape[0]
    SR = angle.shape[1] * angle.shape[2]

    Ep, Ap = _rup(E, 8), _rup(A, 8)
    Hp, Minp = _rup(H, LANE), _rup(Min, LANE)
    Rp, SRp = _rup(R, LANE), _rup(SR, LANE)

    # ---- data: [message | dist], each feature group on its own 128-lane slab ----
    edge_in = jnp.zeros((Ep, Minp + Rp), f32)
    edge_in = edge_in.at[:E, :Min].set(message).at[:E, Minp:Minp + R].set(dist)

    angf = jnp.zeros((Ap, SRp), f32).at[:A, :SR].set(angle.reshape(A, -1))

    # Indices for the one-hot gathers/scatter.  Padded angle slots get an
    # out-of-range index (Ep) -> all-zero one-hot row -> zero contribution.
    src = angle_index[0].astype(jnp.int32)
    tgt = angle_index[1].astype(jnp.int32)
    srcc = jnp.full((Ap, 1), Ep, jnp.int32).at[:A, 0].set(src)
    tgtc = jnp.full((Ap, 1), Ep, jnp.int32).at[:A, 0].set(tgt)
    tgtr = jnp.full((1, Ap), Ep, jnp.int32).at[0, :A].set(tgt)

    # ---- weights: all pre-cast to bf16 ----
    # Fused edge projection [Minp+Rp, 3*Hp]; sm/tmsg/d segments 128-lane aligned.
    wedge = jnp.zeros((Minp + Rp, 3 * Hp), f32)
    wedge = wedge.at[:Min, 0:H].set(params["Wsm"].T)
    wedge = wedge.at[:Min, Hp:Hp + H].set(params["Wtm"].T)
    wedge = wedge.at[Minp:Minp + R, 2 * Hp:2 * Hp + H].set(params["Wd"].T)
    wedge = wedge.astype(bf16)
    bedge = jnp.zeros((1, 3 * Hp), f32)
    bedge = bedge.at[0, 0:H].set(params["bsm"]).at[0, Hp:Hp + H].set(params["btm"])

    # Angle projection weight, block-broadcast over the Hp bilinear slots:
    # wa_exp[:, b*Hp + h] = Wa.T[:, b]  =>  (angf @ wa_exp)[n, b*Hp+h] = a[n, b].
    wa_exp = jnp.repeat(params["Wa"].T, Hp, axis=1)                      # [SR, B*Hp]
    wa_exp = jnp.zeros((SRp, B * Hp), f32).at[:SR, :].set(wa_exp).astype(bf16)

    # Bilinear weight flattened & Hp-padded so the contraction is one K = B*Hp
    # matmul: wbil2d[b*Hp + h, i] = Wbil[i, b, h].
    wbil = jnp.zeros((B, Hp, Hp), f32)
    wbil = wbil.at[:, :H, :H].set(jnp.transpose(params["Wbil"], (1, 2, 0)))
    wbil = wbil.reshape(B * Hp, Hp).astype(bf16)

    def stack_w(layers, D, Dp):
        ws = [jnp.zeros((Dp, Dp), f32).at[:D, :D].set(w.T)
              for lyr in layers for w in (lyr["W1"], lyr["W2"])]
        return jnp.stack(ws).astype(bf16)

    def stack_b(layers, D, Dp):
        bs = [jnp.zeros((Dp,), f32).at[:D].set(b)
              for lyr in layers for b in (lyr["b1"], lyr["b2"])]
        return jnp.stack(bs)

    wb_stack = stack_w(params["before"], H, Hp)
    bb_stack = stack_b(params["before"], H, Hp)
    waft_stack = stack_w(params["after"], Min, Minp)
    baft_stack = stack_b(params["after"], Min, Minp)

    wskip = jnp.zeros((Hp, Minp), f32).at[:H, :Min].set(params["Wskip"].T).astype(bf16)
    bskip = jnp.zeros((1, Minp), f32).at[0, :Min].set(params["bskip"])

    args = (edge_in, angf, srcc, tgtc, tgtr,
            wa_exp, wedge, bedge, wbil,
            wb_stack, bb_stack, wskip, bskip,
            waft_stack, baft_stack)

    vmem = pl.BlockSpec(memory_space=pltpu.MemorySpace.VMEM)
    # TODO(synk): for realistic graph sizes, tile E (and A) with a grid
    # (dimension_semantics=("parallel", ...)), keep the resident bf16 weight set
    # via index_map lambda i: (0, 0), use scalar-prefetch gathers instead of the
    # one-hot matmuls, and size tiles against v7x's 64 MiB VMEM (2x buffering).
    out = pl.pallas_call(
        interaction_kernel,
        out_shape=jax.ShapeDtypeStruct((Ep, Minp), f32),
        in_specs=[vmem] * len(args),
        out_specs=vmem,
    )(*args)
    return out[:E, :Min]


# -----------------------------------------------------------------------------
# Pure-JAX reference (mirrors the PyTorch forward).
#   mxu_bf16=True  : same numerical policy as the kernel (bf16 MXU operands,
#                    f32 accumulation, gathered/scattered operands bf16-rounded).
#   mxu_bf16=False : full-f32 highest-precision gold reference.
# -----------------------------------------------------------------------------
def reference_forward(dist, angle, message, angle_index, params, *, mxu_bf16=True):
    f32 = jnp.float32
    A = angle_index.shape[-1]
    E = dist.shape[0]
    H = params["Wd"].shape[0]
    B = params["Wa"].shape[0]
    act = _silu

    if mxu_bf16:
        rnd = lambda t: t.astype(jnp.bfloat16).astype(f32)
        mm = _mxu
    else:
        rnd = lambda t: t
        mm = lambda x, w: jnp.dot(x, w, precision=lax.Precision.HIGHEST,
                                  preferred_element_type=f32)

    d = mm(dist, params["Wd"].T)                                   # [E, H]
    a = mm(angle.reshape(A, -1), params["Wa"].T)                   # [A, B]
    src, tgt = angle_index[0], angle_index[1]

    # linear is row-wise => project-then-gather == gather-then-project
    sm_e = mm(message, params["Wsm"].T) + params["bsm"]            # [E, H]
    tmsg = mm(message, params["Wtm"].T) + params["btm"]            # [E, H]
    sm = rnd(sm_e)[src] * rnd(d)[tgt]                              # [A, H]

    # einsum('ab,ah,ibh->ai', a, sm, Wbil) as a single [A, B*H] @ [B*H, H] matmul
    scaled = (a[:, :, None] * sm[:, None, :]).reshape(A, B * H)
    wbil2d = jnp.transpose(params["Wbil"], (1, 2, 0)).reshape(B * H, H)
    bil = mm(scaled, wbil2d)                                       # [A, H]

    agg = jnp.zeros((E, H), f32).at[tgt].add(rnd(bil))             # scatter_add
    x, x0 = agg + tmsg, message

    for lyr in params["before"]:
        h = act(mm(x, lyr["W1"].T) + lyr["b1"])
        h = act(mm(h, lyr["W2"].T) + lyr["b2"])
        x = x + h
    x = act(mm(x, params["Wskip"].T) + params["bskip"]) + x0
    for lyr in params["after"]:
        h = act(mm(x, lyr["W1"].T) + lyr["b1"])
        h = act(mm(h, lyr["W2"].T) + lyr["b2"])
        x = x + h
    return x


# -----------------------------------------------------------------------------
# Deterministic parameter construction (synthetic; shapes match the module).
# -----------------------------------------------------------------------------
def init_params(key, R, S, H, B, Min, n_before, n_after):
    keys = iter(jax.random.split(key, 64))

    def w(shape, scale):
        return jax.random.normal(next(keys), shape, jnp.float32) * scale

    def res_layers(n, dim):
        return [
            {
                "W1": w((dim, dim), dim ** -0.5),
                "b1": w((dim,), 0.1),
                "W2": w((dim, dim), dim ** -0.5),
                "b2": w((dim,), 0.1),
            }
            for _ in range(n)
        ]

    return {
        "Wd": w((H, R), R ** -0.5),                 # linear_distance (no bias)
        "Wa": w((B, S * R), (S * R) ** -0.5),       # linear_angle   (no bias)
        "Wsm": w((H, Min), Min ** -0.5),            # linear_source_message
        "bsm": w((H,), 0.1),
        "Wtm": w((H, Min), Min ** -0.5),            # linear_target_message
        "btm": w((H,), 0.1),
        "Wbil": w((H, B, H), 2.0 / H),              # weight_bilinear [i, b, h]
        "before": res_layers(n_before, H),
        "Wskip": w((Min, H), H ** -0.5),            # linear_skip
        "bskip": w((Min,), 0.1),
        "after": res_layers(n_after, Min),
    }


if __name__ == "__main__":
    # small, module-consistent shapes
    R, S, H, B, Min = 6, 7, 32, 8, 32      # radial, spherical, hidden, bilinear, message_in
    E, A = 16, 24                          # edges, angles
    n_before, n_after = 1, 2

    key = jax.random.PRNGKey(0)
    k1, k2, k3, k4, kp = jax.random.split(key, 5)
    dist = jax.random.normal(k1, (E, R), jnp.float32)
    angle = jax.random.normal(k2, (A, S, R), jnp.float32)
    message = jax.random.normal(k3, (E, Min), jnp.float32)
    angle_index = jax.random.randint(k4, (2, A), 0, E, dtype=jnp.int32)
    params = init_params(kp, R, S, H, B, Min, n_before, n_after)

    out = jax.block_until_ready(interaction_block(dist, angle, message, angle_index, params))
    assert out.shape == (E, Min)

    # Structural check: reference with the same numerical policy (bf16 MXU operands,
    # f32 accumulation).  Remaining diffs are accumulation-order noise, so a modest
    # tolerance is used.
    ref_bf16 = reference_forward(dist, angle, message, angle_index, params, mxu_bf16=True)
    err_bf16 = float(jnp.max(jnp.abs(out - ref_bf16)))
    assert jnp.allclose(out, ref_bf16, rtol=2e-2, atol=2e-2), f"policy-matched max err {err_bf16}"

    # Numerical sanity vs the full-f32 highest-precision reference: deviation here is
    # the inherent bf16-operand rounding through the layer stack, not a kernel bug.
    ref_f32 = reference_forward(dist, angle, message, angle_index, params, mxu_bf16=False)
    err_f32 = float(jnp.max(jnp.abs(out - ref_f32)))
    assert err_f32 < 0.5, f"f32-reference max err {err_f32}"

    print("KERNEL_OK")
</pallas_src>

<mosaic_0001>
module attributes {stable_mosaic.version = 11 : i64} {
  func.func @interaction_kernel(%arg0: memref<16x256xf32, #tpu.memory_space<vmem>>, %arg1: memref<24x128xf32, #tpu.memory_space<vmem>>, %arg2: memref<24x1xi32, #tpu.memory_space<vmem>>, %arg3: memref<24x1xi32, #tpu.memory_space<vmem>>, %arg4: memref<1x24xi32, #tpu.memory_space<vmem>>, %arg5: memref<128x1024xbf16, #tpu.memory_space<vmem>>, %arg6: memref<256x384xbf16, #tpu.memory_space<vmem>>, %arg7: memref<1x384xf32, #tpu.memory_space<vmem>>, %arg8: memref<1024x128xbf16, #tpu.memory_space<vmem>>, %arg9: memref<2x128x128xbf16, #tpu.memory_space<vmem>>, %arg10: memref<2x128xf32, #tpu.memory_space<vmem>>, %arg11: memref<128x128xbf16, #tpu.memory_space<vmem>>, %arg12: memref<1x128xf32, #tpu.memory_space<vmem>>, %arg13: memref<4x128x128xbf16, #tpu.memory_space<vmem>>, %arg14: memref<4x128xf32, #tpu.memory_space<vmem>>, %arg15: memref<16x128xf32, #tpu.memory_space<vmem>>) attributes {dimension_semantics = [], scalar_prefetch = 0 : i64, scratch_operands = 0 : i64, tpu.core_type = #tpu.core_type<tc>} {
    %c0 = arith.constant 0 : index
    %c0_0 = arith.constant 0 : index
    %0 = vector.load %arg0[%c0, %c0_0] : memref<16x256xf32, #tpu.memory_space<vmem>>, vector<16x256xf32>
    %1 = vector.extract_strided_slice %0 {offsets = [0, 0], sizes = [16, 128], strides = [1, 1]} : vector<16x256xf32> to vector<16x128xf32>
    %c0_1 = arith.constant 0 : index
    %c0_2 = arith.constant 0 : index
    %2 = vector.load %arg6[%c0_1, %c0_2] : memref<256x384xbf16, #tpu.memory_space<vmem>>, vector<256x384xbf16>
    %3 = arith.truncf %0 : vector<16x256xf32> to vector<16x256xbf16>
    %cst = arith.constant dense<0.000000e+00> : vector<16x384xf32>
    %4 = tpu.matmul %3, %2, %cst {dimension_numbers = #tpu.dot_dimension_numbers<[1], [0], [0], [1], [0, 0, 1, 1], [], []>} : vector<16x256xbf16>, vector<256x384xbf16>, vector<16x384xf32> -> vector<16x384xf32>
    %c0_3 = arith.constant 0 : index
    %c0_4 = arith.constant 0 : index
    %5 = vector.load %arg7[%c0_3, %c0_4] : memref<1x384xf32, #tpu.memory_space<vmem>>, vector<1x384xf32>
    %6 = vector.broadcast %5 : vector<1x384xf32> to vector<16x384xf32>
    %7 = arith.addf %4, %6 : vector<16x384xf32>
    %8 = vector.extract_strided_slice %7 {offsets = [0, 0], sizes = [16, 128], strides = [1, 1]} : vector<16x384xf32> to vector<16x128xf32>
    %9 = vector.extract_strided_slice %7 {offsets = [0, 128], sizes = [16, 128], strides = [1, 1]} : vector<16x384xf32> to vector<16x128xf32>
    %10 = vector.extract_strided_slice %7 {offsets = [0, 256], sizes = [16, 128], strides = [1, 1]} : vector<16x384xf32> to vector<16x128xf32>
    %11 = tpu.iota {dimensions = array<i32: 1>} : vector<24x16xi32>
    %c0_5 = arith.constant 0 : index
    %c0_6 = arith.constant 0 : index
    %12 = vector.load %arg2[%c0_5, %c0_6] : memref<24x1xi32, #tpu.memory_space<vmem>>, vector<24x1xi32>
    %13 = vector.broadcast %12 : vector<24x1xi32> to vector<24x16xi32>
    %14 = arith.cmpi eq, %11, %13 : vector<24x16xi32>
    %15 = arith.extui %14 : vector<24x16xi1> to vector<24x16xi32>
    %16 = arith.sitofp %15 : vector<24x16xi32> to vector<24x16xf32>
    %17 = arith.truncf %16 : vector<24x16xf32> to vector<24x16xbf16>
    %c0_7 = arith.constant 0 : index
    %c0_8 = arith.constant 0 : index
    %18 = vector.load %arg3[%c0_7, %c0_8] : memref<24x1xi32, #tpu.memory_space<vmem>>, vector<24x1xi32>
    %19 = vector.broadcast %18 : vector<24x1xi32> to vector<24x16xi32>
    %20 = arith.cmpi eq, %11, %19 : vector<24x16xi32>
    %21 = arith.extui %20 : vector<24x16xi1> to vector<24x16xi32>
    %22 = arith.sitofp %21 : vector<24x16xi32> to vector<24x16xf32>
    %23 = arith.truncf %22 : vector<24x16xf32> to vector<24x16xbf16>
    %24 = arith.truncf %8 : vector<16x128xf32> to vector<16x128xbf16>
    %cst_9 = arith.constant dense<0.000000e+00> : vector<24x128xf32>
    %25 = tpu.matmul %17, %24, %cst_9 {dimension_numbers = #tpu.dot_dimension_numbers<[1], [0], [0], [1], [0, 0, 1, 1], [], []>} : vector<24x16xbf16>, vector<16x128xbf16>, vector<24x128xf32> -> vector<24x128xf32>
    %26 = arith.truncf %10 : vector<16x128xf32> to vector<16x128xbf16>
    %cst_10 = arith.constant dense<0.000000e+00> : vector<24x128xf32>
    %27 = tpu.matmul %23, %26, %cst_10 {dimension_numbers = #tpu.dot_dimension_numbers<[1], [0], [0], [1], [0, 0, 1, 1], [], []>} : vector<24x16xbf16>, vector<16x128xbf16>, vector<24x128xf32> -> vector<24x128xf32>
    %28 = arith.mulf %25, %27 : vector<24x128xf32>
    %c0_11 = arith.constant 0 : index
    %c0_12 = arith.constant 0 : index
    %29 = vector.load %arg1[%c0_11, %c0_12] : memref<24x128xf32, #tpu.memory_space<vmem>>, vector<24x128xf32>
    %c0_13 = arith.constant 0 : index
    %c0_14 = arith.constant 0 : index
    %30 = vector.load %arg5[%c0_13, %c0_14] : memref<128x1024xbf16, #tpu.memory_space<vmem>>, vector<128x1024xbf16>
    %31 = arith.truncf %29 : vector<24x128xf32> to vector<24x128xbf16>
    %cst_15 = arith.constant dense<0.000000e+00> : vector<24x1024xf32>
    %32 = tpu.matmul %31, %30, %cst_15 {dimension_numbers = #tpu.dot_dimension_numbers<[1], [0], [0], [1], [0, 0, 1, 1], [], []>} : vector<24x128xbf16>, vector<128x1024xbf16>, vector<24x1024xf32> -> vector<24x1024xf32>
    %33 = tpu.concatenate %28, %28, %28, %28, %28, %28, %28, %28 in 1 : vector<24x128xf32>, vector<24x128xf32>, vector<24x128xf32>, vector<24x128xf32>, vector<24x128xf32>, vector<24x128xf32>, vector<24x128xf32>, vector<24x128xf32> -> vector<24x1024xf32>
    %34 = arith.mulf %32, %33 : vector<24x1024xf32>
    %c0_16 = arith.constant 0 : index
    %c0_17 = arith.constant 0 : index
    %35 = vector.load %arg8[%c0_16, %c0_17] : memref<1024x128xbf16, #tpu.memory_space<vmem>>, vector<1024x128xbf16>
    %36 = arith.truncf %34 : vector<24x1024xf32> to vector<24x1024xbf16>
    %cst_18 = arith.constant dense<0.000000e+00> : vector<24x128xf32>
    %37 = tpu.matmul %36, %35, %cst_18 {dimension_numbers = #tpu.dot_dimension_numbers<[1], [0], [0], [1], [0, 0, 1, 1], [], []>} : vector<24x1024xbf16>, vector<1024x128xbf16>, vector<24x128xf32> -> vector<24x128xf32>
    %38 = tpu.iota {dimensions = array<i32: 0>} : vector<16x24xi32>
    %c0_19 = arith.constant 0 : index
    %c0_20 = arith.constant 0 : index
    %39 = vector.load %arg4[%c0_19, %c0_20] : memref<1x24xi32, #tpu.memory_space<vmem>>, vector<1x24xi32>
    %40 = vector.broadcast %39 : vector<1x24xi32> to vector<16x24xi32>
    %41 = arith.cmpi eq, %38, %40 : vector<16x24xi32>
    %42 = arith.extui %41 : vector<16x24xi1> to vector<16x24xi32>
    %43 = arith.sitofp %42 : vector<16x24xi32> to vector<16x24xf32>
    %44 = arith.truncf %43 : vector<16x24xf32> to vector<16x24xbf16>
    %45 = arith.truncf %37 : vector<24x128xf32> to vector<24x128xbf16>
    %cst_21 = arith.constant dense<0.000000e+00> : vector<16x128xf32>
    %46 = tpu.matmul %44, %45, %cst_21 {dimension_numbers = #tpu.dot_dimension_numbers<[1], [0], [0], [1], [0, 0, 1, 1], [], []>} : vector<16x24xbf16>, vector<24x128xbf16>, vector<16x128xf32> -> vector<16x128xf32>
    %47 = arith.addf %46, %9 : vector<16x128xf32>
    %c0_22 = arith.constant 0 : index
    %c0_23 = arith.constant 0 : index
    %c0_24 = arith.constant 0 : index
    %48 = vector.load %arg9[%c0_22, %c0_23, %c0_24] : memref<2x128x128xbf16, #tpu.memory_space<vmem>>, vector<1x128x128xbf16>
    %49 = vector.shape_cast %48 : vector<1x128x128xbf16> to vector<128x128xbf16>
    %50 = arith.truncf %47 : vector<16x128xf32> to vector<16x128xbf16>
    %cst_25 = arith.constant dense<0.000000e+00> : vector<16x128xf32>
    %51 = tpu.matmul %50, %49, %cst_25 {dimension_numbers = #tpu.dot_dimension_numbers<[1], [0], [0], [1], [0, 0, 1, 1], [], []>} : vector<16x128xbf16>, vector<128x128xbf16>, vector<16x128xf32> -> vector<16x128xf32>
    %c0_26 = arith.constant 0 : index
    %c0_27 = arith.constant 0 : index
    %52 = vector.load %arg10[%c0_26, %c0_27] : memref<2x128xf32, #tpu.memory_space<vmem>>, vector<1x128xf32>
    %53 = vector.broadcast %52 : vector<1x128xf32> to vector<16x128xf32>
    %54 = arith.addf %51, %53 : vector<16x128xf32>
    %55 = arith.negf %54 : vector<16x128xf32>
    %56 = math.exp %55 : vector<16x128xf32>
    %cst_28 = arith.constant 1.000000e+00 : f32
    %57 = vector.broadcast %cst_28 : f32 to vector<16x128xf32>
    %58 = arith.addf %57, %56 : vector<16x128xf32>
    %59 = arith.divf %57, %58 : vector<16x128xf32>
    %60 = arith.mulf %54, %59 : vector<16x128xf32>
    %c1 = arith.constant 1 : index
    %c0_29 = arith.constant 0 : index
    %c0_30 = arith.constant 0 : index
    %61 = vector.load %arg9[%c1, %c0_29, %c0_30] : memref<2x128x128xbf16, #tpu.memory_space<vmem>>, vector<1x128x128xbf16>
    %62 = vector.shape_cast %61 : vector<1x128x128xbf16> to vector<128x128xbf16>
    %63 = arith.truncf %60 : vector<16x128xf32> to vector<16x128xbf16>
    %cst_31 = arith.constant dense<0.000000e+00> : vector<16x128xf32>
    %64 = tpu.matmul %63, %62, %cst_31 {dimension_numbers = #tpu.dot_dimension_numbers<[1], [0], [0], [1], [0, 0, 1, 1], [], []>} : vector<16x128xbf16>, vector<128x128xbf16>, vector<16x128xf32> -> vector<16x128xf32>
    %c1_32 = arith.constant 1 : index
    %c0_33 = arith.constant 0 : index
    %65 = vector.load %arg10[%c1_32, %c0_33] : memref<2x128xf32, #tpu.memory_space<vmem>>, vector<1x128xf32>
    %66 = vector.broadcast %65 : vector<1x128xf32> to vector<16x128xf32>
    %67 = arith.addf %64, %66 : vector<16x128xf32>
    %68 = arith.negf %67 : vector<16x128xf32>
    %69 = math.exp %68 : vector<16x128xf32>
    %cst_34 = arith.constant 1.000000e+00 : f32
    %70 = vector.broadcast %cst_34 : f32 to vector<16x128xf32>
    %71 = arith.addf %70, %69 : vector<16x128xf32>
    %72 = arith.divf %70, %71 : vector<16x128xf32>
    %73 = arith.mulf %67, %72 : vector<16x128xf32>
    %74 = arith.addf %47, %73 : vector<16x128xf32>
    %c0_35 = arith.constant 0 : index
    %c0_36 = arith.constant 0 : index
    %75 = vector.load %arg11[%c0_35, %c0_36] : memref<128x128xbf16, #tpu.memory_space<vmem>>, vector<128x128xbf16>
    %76 = arith.truncf %74 : vector<16x128xf32> to vector<16x128xbf16>
    %cst_37 = arith.constant dense<0.000000e+00> : vector<16x128xf32>
    %77 = tpu.matmul %76, %75, %cst_37 {dimension_numbers = #tpu.dot_dimension_numbers<[1], [0], [0], [1], [0, 0, 1, 1], [], []>} : vector<16x128xbf16>, vector<128x128xbf16>, vector<16x128xf32> -> vector<16x128xf32>
    %c0_38 = arith.constant 0 : index
    %c0_39 = arith.constant 0 : index
    %78 = vector.load %arg12[%c0_38, %c0_39] : memref<1x128xf32, #tpu.memory_space<vmem>>, vector<1x128xf32>
    %79 = vector.broadcast %78 : vector<1x128xf32> to vector<16x128xf32>
    %80 = arith.addf %77, %79 : vector<16x128xf32>
    %81 = arith.negf %80 : vector<16x128xf32>
    %82 = math.exp %81 : vector<16x128xf32>
    %cst_40 = arith.constant 1.000000e+00 : f32
    %83 = vector.broadcast %cst_40 : f32 to vector<16x128xf32>
    %84 = arith.addf %83, %82 : vector<16x128xf32>
    %85 = arith.divf %83, %84 : vector<16x128xf32>
    %86 = arith.mulf %80, %85 : vector<16x128xf32>
    %87 = arith.addf %86, %1 : vector<16x128xf32>
    %c0_41 = arith.constant 0 : index
    %c0_42 = arith.constant 0 : index
    %c0_43 = arith.constant 0 : index
    %88 = vector.load %arg13[%c0_41, %c0_42, %c0_43] : memref<4x128x128xbf16, #tpu.memory_space<vmem>>, vector<1x128x128xbf16>
    %89 = vector.shape_cast %88 : vector<1x128x128xbf16> to vector<128x128xbf16>
    %90 = arith.truncf %87 : vector<16x128xf32> to vector<16x128xbf16>
    %cst_44 = arith.constant dense<0.000000e+00> : vector<16x128xf32>
    %91 = tpu.matmul %90, %89, %cst_44 {dimension_numbers = #tpu.dot_dimension_numbers<[1], [0], [0], [1], [0, 0, 1, 1], [], []>} : vector<16x128xbf16>, vector<128x128xbf16>, vector<16x128xf32> -> vector<16x128xf32>
    %c0_45 = arith.constant 0 : index
    %c0_46 = arith.constant 0 : index
    %92 = vector.load %arg14[%c0_45, %c0_46] : memref<4x128xf32, #tpu.memory_space<vmem>>, vector<1x128xf32>
    %93 = vector.broadcast %92 : vector<1x128xf32> to vector<16x128xf32>
    %94 = arith.addf %91, %93 : vector<16x128xf32>
    %95 = arith.negf %94 : vector<16x128xf32>
    %96 = math.exp %95 : vector<16x128xf32>
    %cst_47 = arith.constant 1.000000e+00 : f32
    %97 = vector.broadcast %cst_47 : f32 to vector<16x128xf32>
    %98 = arith.addf %97, %96 : vector<16x128xf32>
    %99 = arith.divf %97, %98 : vector<16x128xf32>
    %100 = arith.mulf %94, %99 : vector<16x128xf32>
    %c1_48 = arith.constant 1 : index
    %c0_49 = arith.constant 0 : index
    %c0_50 = arith.constant 0 : index
    %101 = vector.load %arg13[%c1_48, %c0_49, %c0_50] : memref<4x128x128xbf16, #tpu.memory_space<vmem>>, vector<1x128x128xbf16>
    %102 = vector.shape_cast %101 : vector<1x128x128xbf16> to vector<128x128xbf16>
    %103 = arith.truncf %100 : vector<16x128xf32> to vector<16x128xbf16>
    %cst_51 = arith.constant dense<0.000000e+00> : vector<16x128xf32>
    %104 = tpu.matmul %103, %102, %cst_51 {dimension_numbers = #tpu.dot_dimension_numbers<[1], [0], [0], [1], [0, 0, 1, 1], [], []>} : vector<16x128xbf16>, vector<128x128xbf16>, vector<16x128xf32> -> vector<16x128xf32>
    %c1_52 = arith.constant 1 : index
    %c0_53 = arith.constant 0 : index
    %105 = vector.load %arg14[%c1_52, %c0_53] : memref<4x128xf32, #tpu.memory_space<vmem>>, vector<1x128xf32>
    %106 = vector.broadcast %105 : vector<1x128xf32> to vector<16x128xf32>
    %107 = arith.addf %104, %106 : vector<16x128xf32>
    %108 = arith.negf %107 : vector<16x128xf32>
    %109 = math.exp %108 : vector<16x128xf32>
    %cst_54 = arith.constant 1.000000e+00 : f32
    %110 = vector.broadcast %cst_54 : f32 to vector<16x128xf32>
    %111 = arith.addf %110, %109 : vector<16x128xf32>
    %112 = arith.divf %110, %111 : vector<16x128xf32>
    %113 = arith.mulf %107, %112 : vector<16x128xf32>
    %114 = arith.addf %87, %113 : vector<16x128xf32>
    %c2 = arith.constant 2 : index
    %c0_55 = arith.constant 0 : index
    %c0_56 = arith.constant 0 : index
    %115 = vector.load %arg13[%c2, %c0_55, %c0_56] : memref<4x128x128xbf16, #tpu.memory_space<vmem>>, vector<1x128x128xbf16>
    %116 = vector.shape_cast %115 : vector<1x128x128xbf16> to vector<128x128xbf16>
    %117 = arith.truncf %114 : vector<16x128xf32> to vector<16x128xbf16>
    %cst_57 = arith.constant dense<0.000000e+00> : vector<16x128xf32>
    %118 = tpu.matmul %117, %116, %cst_57 {dimension_numbers = #tpu.dot_dimension_numbers<[1], [0], [0], [1], [0, 0, 1, 1], [], []>} : vector<16x128xbf16>, vector<128x128xbf16>, vector<16x128xf32> -> vector<16x128xf32>
    %c2_58 = arith.constant 2 : index
    %c0_59 = arith.constant 0 : index
    %119 = vector.load %arg14[%c2_58, %c0_59] : memref<4x128xf32, #tpu.memory_space<vmem>>, vector<1x128xf32>
    %120 = vector.broadcast %119 : vector<1x128xf32> to vector<16x128xf32>
    %121 = arith.addf %118, %120 : vector<16x128xf32>
    %122 = arith.negf %121 : vector<16x128xf32>
    %123 = math.exp %122 : vector<16x128xf32>
    %cst_60 = arith.constant 1.000000e+00 : f32
    %124 = vector.broadcast %cst_60 : f32 to vector<16x128xf32>
    %125 = arith.addf %124, %123 : vector<16x128xf32>
    %126 = arith.divf %124, %125 : vector<16x128xf32>
    %127 = arith.mulf %121, %126 : vector<16x128xf32>
    %c3 = arith.constant 3 : index
    %c0_61 = arith.constant 0 : index
    %c0_62 = arith.constant 0 : index
    %128 = vector.load %arg13[%c3, %c0_61, %c0_62] : memref<4x128x128xbf16, #tpu.memory_space<vmem>>, vector<1x128x128xbf16>
    %129 = vector.shape_cast %128 : vector<1x128x128xbf16> to vector<128x128xbf16>
    %130 = arith.truncf %127 : vector<16x128xf32> to vector<16x128xbf16>
    %cst_63 = arith.constant dense<0.000000e+00> : vector<16x128xf32>
    %131 = tpu.matmul %130, %129, %cst_63 {dimension_numbers = #tpu.dot_dimension_numbers<[1], [0], [0], [1], [0, 0, 1, 1], [], []>} : vector<16x128xbf16>, vector<128x128xbf16>, vector<16x128xf32> -> vector<16x128xf32>
    %c3_64 = arith.constant 3 : index
    %c0_65 = arith.constant 0 : index
    %132 = vector.load %arg14[%c3_64, %c0_65] : memref<4x128xf32, #tpu.memory_space<vmem>>, vector<1x128xf32>
    %133 = vector.broadcast %132 : vector<1x128xf32> to vector<16x128xf32>
    %134 = arith.addf %131, %133 : vector<16x128xf32>
    %135 = arith.negf %134 : vector<16x128xf32>
    %136 = math.exp %135 : vector<16x128xf32>
    %cst_66 = arith.constant 1.000000e+00 : f32
    %137 = vector.broadcast %cst_66 : f32 to vector<16x128xf32>
    %138 = arith.addf %137, %136 : vector<16x128xf32>
    %139 = arith.divf %137, %138 : vector<16x128xf32>
    %140 = arith.mulf %134, %139 : vector<16x128xf32>
    %141 = arith.addf %114, %140 : vector<16x128xf32>
    %c0_67 = arith.constant 0 : index
    %c0_68 = arith.constant 0 : index
    %142 = vector.load %arg15[%c0_67, %c0_68] : memref<16x128xf32, #tpu.memory_space<vmem>>, vector<16x128xf32>
    tpu.vector_store %arg15[%c0_67, %c0_68], %141 {strides = array<i32>} : memref<16x128xf32, #tpu.memory_space<vmem>>, vector<16x128xf32>,
    return
  }
}

</mosaic_0001>

<bundles_post_ra>
// kernel: tpu_custom_call.1
= control target key start
LH: loop header
LB: loop body
LE: loop exit
PB: predicated region body
PF: predicated region fallthrough
CT: control target
= control target key end

     0   :  { %20 = vsyncpa [#allocation3], 0  ;;  %s4616_s0 = inlined_call_operand.hbm [shape: f32[16,256], index: 0, kind: input, shape index: {}]   ;;  %s4617_s1 = inlined_call_operand.hbm [shape: f32[24,128], index: 1, kind: input, shape index: {}]   ;;  %s4618_s2 = inlined_call_operand.vmem [shape: s32[24,1], index: 2, kind: input, shape index: {}]   ;;  %s4619_s3 = inlined_call_operand.vmem [shape: s32[24,1], index: 3, kind: input, shape index: {}]   ;;  %s4620_s4 = inlined_call_operand.hbm [shape: s32[1,24], index: 4, kind: input, shape index: {}]   ;;  %s4621_s5 = inlined_call_operand.hbm [shape: bf16[128,1024], index: 5, kind: input, shape index: {}]   ;;  %s4622_s6 = inlined_call_operand.hbm [shape: bf16[256,384], index: 6, kind: input, shape index: {}]   ;;  %s4623_s7 = inlined_call_operand.hbm [shape: f32[1,384], index: 7, kind: input, shape index: {}]   ;;  %s4624_s8 = inlined_call_operand.hbm [shape: bf16[1024,128], index: 8, kind: input, shape index: {}]   ;;  %s4625_s9 = inlined_call_operand.hbm [shape: bf16[2,128,128], index: 9, kind: input, shape index: {}]   ;;  %s4626_s10 = inlined_call_operand.vmem [shape: f32[2,128], index: 10, kind: input, shape index: {}]   ;;  %s4627_s11 = inlined_call_operand.vmem [shape: bf16[128,128], index: 11, kind: input, shape index: {}]   ;;  %s4628_s12 = inlined_call_operand.vmem [shape: f32[1,128], index: 12, kind: input, shape index: {}]   ;;  %s4629_s13 = inlined_call_operand.hbm [shape: bf16[4,128,128], index: 13, kind: input, shape index: {}]   ;;  %s4630_s14 = inlined_call_operand.vmem [shape: f32[4,128], index: 14, kind: input, shape index: {}]   ;;  %s4631_s15 = inlined_call_operand.hbm [shape: f32[16,128], index: 15, kind: output, shape index: {}]  }
   0x1   :  { %21 = vsyncpa [#allocation6], 0 }
   0x2   :  { %22 = vsyncpa [#allocation9], 0 }
   0x3   :  { %23 = vsyncpa [#allocation12], 0 }
   0x4   :  { %24 = vsyncpa [#allocation15], 0 }
   0x5   :  { %25 = vsyncpa [#allocation4], 0  ;;  %s4186_s18 = smov [#allocation5]  }
   0x6   :  { %s43_s19 = sshll.u32 %s4186_s18, 4  ;;  %s44_s19 = int_to_ptr.vmem [resolvable:$true] %s43_s19 }
   0x7   :  { %s3982_s20 = scalar_lea.vmem %s44_s19, 384  ;;  %p3987_p1 = scmp.lt.s32.totalorder %s44_s19, %s44_s19 }
   0x8   :  { %p3983_p0 = scmp.ne.s32.totalorder %s44_s19, %s3982_s20  ;;  %p3988_p2 = scmp.lt.s32.totalorder %s3982_s20, %s3982_s20 }
   0xa   :  { %p3989_p3 = por %p3988_p2, %p3987_p1 }
   0xc   :  { %p3990_p4 = pnand %p3989_p3, %p3983_p0 }
   0xe   :  { %3993 = shalt.err (!%p3990_p4)
}
   0xf   :  { %s4187_s21 = smov 128   ;;  %s4188_s22 = smov 8  }
  0x10   :  { %49 = dma.hbm_to_vmem [thread:$0]  %s4617_s1, 384, %s44_s19, [#allocation6], %s4187_s21, %s4187_s21, %s4188_s22  }
  0x11   :  { %s4189_s25 = smov [#allocation8]  }
  0x12   :  { %s69_s26 = sshll.u32 %s4189_s25, 4  ;;  %s70_s26 = int_to_ptr.vmem [resolvable:$true] %s69_s26 }
  0x13   :  { %s4002_s27 = scalar_lea.vmem %s70_s26, 8192  ;;  %p4007_p6 = scmp.lt.s32.totalorder %s70_s26, %s70_s26 }
  0x14   :  { %p4003_p5 = scmp.ne.s32.totalorder %s70_s26, %s4002_s27  ;;  %p4008_p7 = scmp.lt.s32.totalorder %s4002_s27, %s4002_s27 }
  0x16   :  { %p4009_p8 = por %p4008_p7, %p4007_p6 }
  0x18   :  { %p4010_p9 = pnand %p4009_p8, %p4003_p5 }
  0x1a   :  { %4013 = shalt.err (!%p4010_p9)
}
  0x1b   :  { %s4190_s28 = smov 512   ;;  %s4191_s29 = smov 32  }
  0x1c   :  { %75 = dma.hbm_to_vmem [thread:$0]  %s4621_s5, 8192, %s70_s26, [#allocation9], %s4190_s28, %s4190_s28, %s4191_s29  }
  0x1d   :  { %s4192_s17 = smov [#allocation11]  }
  0x1e   :  { %s94_s18 = sshll.u32 %s4192_s17, 4  ;;  %s95_s18 = int_to_ptr.vmem [resolvable:$true] %s94_s18 }
  0x1f   :  { %s4022_s1 = scalar_lea.vmem %s95_s18, 48  ;;  %s4026_s19 = scalar_lea.vmem %s95_s18, 64 }
  0x20   :  { %p4023_p10 = scmp.ne.s32.totalorder %s95_s18, %s4022_s1  ;;  %p4027_p11 = scmp.lt.s32.totalorder %s95_s18, %s95_s18 }
  0x21   :  { %p4028_p12 = scmp.lt.s32.totalorder %s4026_s19, %s4022_s1 }
  0x23   :  { %p4029_p13 = por %p4028_p12, %p4027_p11 }
  0x25   :  { %p4030_p0 = pnand %p4029_p13, %p4023_p10 }
  0x27   :  { %4033 = shalt.err (!%p4030_p0)
}
  0x28   :  { %97 = dma.hbm_to_vmem [thread:$0]  %s4623_s7, 48, %s95_s18, [#allocation12]  }
  0x29   :  { %s4193_s24 = smov [#allocation14]   ;;  %s4194_s27 = smov [#allocation2]  }
  0x2a   :  { %s115_s25 = sshll.u32 %s4193_s24, 4  ;;  %s31_s5 = sshll.u32 %s4194_s27, 4  ;;  %s116_s25 = int_to_ptr.vmem [resolvable:$true] %s115_s25  ;;  %s32_s5 = int_to_ptr.vmem [resolvable:$true] %s31_s5 }
  0x2b   :  { %s4042_s26 = scalar_lea.vmem %s116_s25, 2048  ;;  %p4047_p2 = scmp.lt.s32.totalorder %s116_s25, %s116_s25 }
  0x2c   :  { %p4043_p1 = scmp.ne.s32.totalorder %s116_s25, %s4042_s26  ;;  %p4048_p3 = scmp.lt.s32.totalorder %s4042_s26, %s4042_s26 }
  0x2e   :  { %p4049_p4 = por %p4048_p3, %p4047_p2 }
  0x30   :  { %p4050_p5 = pnand %p4049_p4, %p4043_p1 }
  0x32   :  { %4053 = shalt.err (!%p4050_p5)
}
  0x33   :  { %s4195_s28 = smov 64   ;;  %s4196_s29 = smov 4  }
  0x34   :  { %121 = dma.hbm_to_vmem [thread:$0]  %s4625_s9, 2048, %s116_s25, [#allocation15], %s4195_s28, %s4195_s28, %s4196_s29  }
  0x35   :  { %s4062_s7 = scalar_lea.vmem %s32_s5, 512  ;;  %p4067_p7 = scmp.lt.s32.totalorder %s32_s5, %s32_s5 }
  0x36   :  { %p4063_p6 = scmp.ne.s32.totalorder %s32_s5, %s4062_s7  ;;  %p4068_p8 = scmp.lt.s32.totalorder %s4062_s7, %s4062_s7 }
  0x38   :  { %p4069_p9 = por %p4068_p8, %p4067_p7 }
  0x3a   :  { %p4070_p10 = pnand %p4069_p9, %p4063_p6 }
  0x3c   :  { %4073 = shalt.err (!%p4070_p10)
}
  0x3d   :  { %s4197_s17 = smov 256   ;;  %s4198_s18 = smov 16  }
  0x3e   :  { %37 = dma.hbm_to_vmem [thread:$0]  %s4616_s0, 512, %s32_s5, [#allocation3], %s4197_s17, %s4197_s17, %s4198_s18  }
  0x3f   :  { %s4199_s20 = smov [#allocation7]   ;;  %s4200_s24 = smov [#allocation10]  }
  0x40   :  { %s60_s23 = sshll.u32 %s4199_s20, 4  ;;  %s81_s27 = sshll.u32 %s4200_s24, 4  ;;  %s61_s23 = int_to_ptr.vmem [resolvable:$true] %s60_s23  ;;  %s82_s27 = int_to_ptr.vmem [resolvable:$true] %s81_s27 }
  0x41   :  { %s4082_s9 = scalar_lea.vmem %s61_s23, 16  ;;  %s4086_s25 = scalar_lea.vmem %s61_s23, 32 }
  0x42   :  { %p4083_p11 = scmp.ne.s32.totalorder %s61_s23, %s4082_s9  ;;  %p4087_p12 = scmp.lt.s32.totalorder %s61_s23, %s61_s23 }
  0x43   :  { %p4088_p13 = scmp.lt.s32.totalorder %s4086_s25, %s4082_s9 }
  0x45   :  { %p4089_p0 = por %p4088_p13, %p4087_p12 }
  0x47   :  { %p4090_p1 = pnand %p4089_p0, %p4083_p11 }
  0x49   :  { %4093 = shalt.err (!%p4090_p1)
}
  0x4a   :  { %63 = dma.hbm_to_vmem [thread:$0]  %s4620_s4, 16, %s61_s23, [#allocation6]  }
  0x4b   :  { %s4102_s16 = scalar_lea.vmem %s82_s27, 6144  ;;  %p4107_p3 = scmp.lt.s32.totalorder %s82_s27, %s82_s27 }
  0x4c   :  { %p4103_p2 = scmp.ne.s32.totalorder %s82_s27, %s4102_s16  ;;  %p4108_p4 = scmp.lt.s32.totalorder %s4102_s16, %s4102_s16 }
  0x4e   :  { %p4109_p5 = por %p4108_p4, %p4107_p3 }
  0x50   :  { %p4110_p6 = pnand %p4109_p5, %p4103_p2 }
  0x52   :  { %4113 = shalt.err (!%p4110_p6)
}
  0x53   :  { %s4201_s0 = smov 192   ;;  %s4202_s5 = smov 12  }
  0x54   :  { %87 = dma.hbm_to_vmem [thread:$0]  %s4622_s6, 6144, %s82_s27, [#allocation9], %s4201_s0, %s4201_s0, %s4202_s5  }
  0x55   :  { %s4203_s18 = smov [#allocation13]   ;;  %s4204_s19 = smov [#allocation16]  }
  0x56   :  { %s103_s1 = sshll.u32 %s4203_s18, 4  ;;  %s133_s20 = sshll.u32 %s4204_s19, 4  ;;  %s104_s1 = int_to_ptr.vmem [resolvable:$true] %s103_s1  ;;  %s134_s20 = int_to_ptr.vmem [resolvable:$true] %s133_s20 }
  0x57   :  { %s4122_s4 = scalar_lea.vmem %s104_s1, 8192  ;;  %p4127_p8 = scmp.lt.s32.totalorder %s104_s1, %s104_s1 }
  0x58   :  { %p4123_p7 = scmp.ne.s32.totalorder %s104_s1, %s4122_s4  ;;  %p4128_p9 = scmp.lt.s32.totalorder %s4122_s4, %s4122_s4 }
  0x5a   :  { %p4129_p10 = por %p4128_p9, %p4127_p8 }
  0x5c   :  { %p4130_p11 = pnand %p4129_p10, %p4123_p7 }
  0x5e   :  { %4133 = shalt.err (!%p4130_p11)
}
  0x5f   :  { %109 = dma.hbm_to_vmem [thread:$0]  %s4624_s8, 8192, %s104_s1, [#allocation12], %s4195_s28, %s4195_s28, %s4196_s29  }
  0x60   :  { %s4142_s6 = scalar_lea.vmem %s134_s20, 4096  ;;  %p4147_p13 = scmp.lt.s32.totalorder %s134_s20, %s134_s20 }
  0x61   :  { %p4143_p12 = scmp.ne.s32.totalorder %s134_s20, %s4142_s6  ;;  %p4148_p0 = scmp.lt.s32.totalorder %s4142_s6, %s4142_s6 }
  0x63   :  { %p4149_p1 = por %p4148_p0, %p4147_p13 }
  0x65   :  { %p4150_p2 = pnand %p4149_p1, %p4143_p12 }
  0x67   :  { %4153 = shalt.err (!%p4150_p2)
}
  0x68   :  { %139 = dma.hbm_to_vmem [thread:$0]  %s4629_s13, 4096, %s134_s20, [#allocation15], %s4195_s28, %s4195_s28, %s4196_s29  }
  0x69   :  { %4174 = dma.done.wait [#allocation3], 512  }
  0x6a   :  { %4175 = vsyncadd [#allocation3], 4294966784 }
  0x6b   :  { %4176 = dma.done.wait [#allocation6], 400  }
  0x6c   :  { %4177 = vsyncadd [#allocation6], 4294966896 }
  0x6d   :  { %4178 = dma.done.wait [#allocation9], 14336  }
  0x6e   :  { %4179 = vsyncadd [#allocation9], 4294952960 }
  0x6f   :  { %4180 = dma.done.wait [#allocation12], 8240  }
  0x70   :  { %4181 = vsyncadd [#allocation12], 4294959056 }
  0x71   :  { %4182 = dma.done.wait [#allocation15], 6144  }
  0x72   :  { %4183 = vsyncadd [#allocation15], 4294961152  ;;  %v4205_v0 = vmov 0   ;;  %v3732_v1 = vld [vmem:[#allocation10 + $0xac] ss:$12 sps:$4 sm:$0xff]   ;;  %v173_v39 = vld [vmem:[#allocation2 + $0x18] sm:$0xff] }
  0x73   :  { %3730 = vset.pattern.permute.xlu0 %v4205_v0  ;;  %3731 = vset.pattern.permute.xlu1 %v4205_v0  ;;  %v3734_v2 = vld [vmem:[#allocation10 + $0xa8] ss:$12 sps:$4 sm:$0xff]   ;;  %v3737_v4 = vld [vmem:[#allocation10 + $0x90] ss:$12 sps:$4 sm:$0xff]   ;;  %v3740_v6 = vld [vmem:[#allocation10 + $0x78] ss:$12 sps:$4 sm:$0xff]  }
  0x74   :  { %513 = vmatprep.subr.bf16.mxu0 %v3732_v1  ;;  %v3735_v3 = vld [vmem:[#allocation10 + $0x94] ss:$12 sps:$4 sm:$0xff]   ;;  %v3738_v5 = vld [vmem:[#allocation10 + $0x7c] ss:$12 sps:$4 sm:$0xff]   ;;  %v3741_v7 = vld [vmem:[#allocation10 + $0x64] ss:$12 sps:$4 sm:$0xff]  }
  0x75   :  { %514 = vmatpush1.bf16.msra.mxu0 %v3734_v2  ;;  %v3743_v8 = vld [vmem:[#allocation10 + $0x60] ss:$12 sps:$4 sm:$0xff]   ;;  %v3756_v10 = vld [vmem:[#allocation10 + $0x170] ss:$12 sps:$4 sm:$0xff]   ;;  %v3746_v12 = vld [vmem:[#allocation10 + $0x48] ss:$12 sps:$4 sm:$0xff]  }
  0x76   :  { %515 = vmatprep.subr.bf16.mxu0 %v3735_v3  ;;  %v3744_v9 = vld [vmem:[#allocation10 + $0x4c] ss:$12 sps:$4 sm:$0xff]   ;;  %v3757_v11 = vld [vmem:[#allocation10 + $0xb0] ss:$12 sps:$4 sm:$0xff]   ;;  %3341 = vmatprep.subr.bf16.mxu1 %v3756_v10  ;;  %v3747_v15 = vld [vmem:[#allocation10 + $0x34] ss:$12 sps:$4 sm:$0xff]  }
  0x77   :  { %3342 = vmatpush3.bf16.msra.mxu1 %v3757_v11  ;;  %v3761_v13 = vld [vmem:[#allocation10 + $0x158] ss:$12 sps:$4 sm:$0xff]   ;;  %v3749_v16 = vld [vmem:[#allocation10 + $0x30] ss:$12 sps:$4 sm:$0xff]   ;;  %v3766_v17 = vld [vmem:[#allocation10 + $0x140] ss:$12 sps:$4 sm:$0xff]  }
  0x78   :  { %v3762_v14 = vld [vmem:[#allocation10 + $0x98] ss:$12 sps:$4 sm:$0xff]   ;;  %3343 = vmatprep.subr.bf16.mxu1 %v3761_v13  ;;  %v3767_v18 = vld [vmem:[#allocation10 + $0x80] ss:$12 sps:$4 sm:$0xff]   ;;  %v3750_v19 = vld [vmem:[#allocation10 + $0x1c] ss:$12 sps:$4 sm:$0xff]  }
  0x79   :  { %516 = vmatpush1.bf16.msra.mxu0 %v3737_v4  ;;  %v3771_v20 = vld [vmem:[#allocation10 + $0x128] ss:$12 sps:$4 sm:$0xff]   ;;  %v3752_v22 = vld [vmem:[#allocation10 + $0x18] ss:$12 sps:$4 sm:$0xff]   ;;  %v3776_v24 = vld [vmem:[#allocation10 + $0x110] ss:$12 sps:$4 sm:$0xff]  }
  0x7a   :  { %517 = vmatprep.subr.bf16.mxu0 %v3738_v5  ;;  %v3772_v21 = vld [vmem:[#allocation10 + $0x68] ss:$12 sps:$4 sm:$0xff]   ;;  %v3753_v23 = vld [vmem:[#allocation10 + $0x4] ss:$12 sps:$4 sm:$0xff]   ;;  %v3755_v25 = vld [vmem:[#allocation10] ss:$12 sps:$4 sm:$0xff]  }
  0x7b   :  { %3344 = vmatpush3.bf16.msra.mxu1 %v3762_v14  ;;  %v3777_v26 = vld [vmem:[#allocation10 + $0x50] ss:$12 sps:$4 sm:$0xff]   ;;  %v3758_v27 = vld [vmem:[#allocation10 + $0x16c] ss:$12 sps:$4 sm:$0xff]   ;;  %v3760_v29 = vld [vmem:[#allocation10 + $0x168] ss:$12 sps:$4 sm:$0xff]  }
  0x7c   :  { %3345 = vmatprep.subr.bf16.mxu1 %v3766_v17  ;;  %v3781_v28 = vld [vmem:[#allocation10 + $0xf8] ss:$12 sps:$4 sm:$0xff]   ;;  %v3786_v31 = vld [vmem:[#allocation10 + $0xe0] ss:$12 sps:$4 sm:$0xff]   ;;  %v3765_v33 = vld [vmem:[#allocation10 + $0x150] ss:$12 sps:$4 sm:$0xff]  }
  0x7d   :  { %518 = vmatpush1.bf16.msra.mxu0 %v3740_v6  ;;  %v3782_v30 = vld [vmem:[#allocation10 + $0x38] ss:$12 sps:$4 sm:$0xff]   ;;  %v3763_v32 = vld [vmem:[#allocation10 + $0x154] ss:$12 sps:$4 sm:$0xff]   ;;  %v3768_v36 = vld [vmem:[#allocation10 + $0x13c] ss:$12 sps:$4 sm:$0xff]  }
  0x7e   :  { %519 = vmatprep.subr.bf16.mxu0 %v3741_v7  ;;  %v3787_v34 = vld [vmem:[#allocation10 + $0x20] ss:$12 sps:$4 sm:$0xff]   ;;  %v3791_v35 = vld [vmem:[#allocation10 + $0xc8] ss:$12 sps:$4 sm:$0xff]   ;;  %v3770_v44 = vld [vmem:[#allocation10 + $0x138] ss:$12 sps:$4 sm:$0xff]  }
  0x7f   :  { %3346 = vmatpush3.bf16.msra.mxu1 %v3767_v18  ;;  %v3792_v37 = vld [vmem:[#allocation10 + $0x8] ss:$12 sps:$4 sm:$0xff]   ;;  %v3773_v46 = vld [vmem:[#allocation10 + $0x124] ss:$12 sps:$4 sm:$0xff]   ;;  %v3775_v49 = vld [vmem:[#allocation10 + $0x120] ss:$12 sps:$4 sm:$0xff]  }
  0x80   :  { %3347 = vmatprep.subr.bf16.mxu1 %v3771_v20  ;;  %v171_v38 = vld [vmem:[#allocation2 + $0x8] sm:$0xff]  ;;  %v170_v41 = vld [vmem:[#allocation2] sm:$0xff]  ;;  %v172_v42 = vld [vmem:[#allocation2 + $0x10] sm:$0xff]  ;;  %vm646_vm2 = vcmask 130048   ;;  %vm4207_vm7 = vmmov 0   ;;  %vm2117_vm8 = vcmask 1043456  }
  0x81   :  { %520 = vmatpush1.bf16.msra.mxu0 %v3743_v8  ;;  %v239_v40 = vpack.c.bf16 %v173_v39, %v171_v38  ;;  %v599_v43 = vld [vmem:[%s4618_s2] sm:$0xff]  ;;  %v601_v45 = vld [vmem:[%s4618_s2 + $0x10] sm:$0xff]  ;;  %v238_v47 = vpack.c.bf16 %v172_v42, %v170_v41  ;;  %v600_v48 = vld [vmem:[%s4618_s2 + $0x8] sm:$0xff]  ;;  %vm2113_vm11 = vcmask 195584  }
  0x82   :  { %521 = vmatprep.subr.bf16.mxu0 %v3744_v9  ;;  %603 = vperm.xlu0 %3730, %v599_v43   ;;  %v622_v50 = vld [vmem:[%s4619_s3] sm:$0xff]  ;;  %v623_v52 = vld [vmem:[%s4619_s3 + $0x8] sm:$0xff]  ;;  %v624_v54 = vld [vmem:[%s4619_s3 + $0x10] sm:$0xff] }
  0x83   :  { %3348 = vmatpush3.bf16.msra.mxu1 %v3772_v21  ;;  %588 = vmatprep.mubr.bf16.mxu1 %v239_v40  ;;  %v3778_v51 = vld [vmem:[#allocation10 + $0x10c] ss:$12 sps:$4 sm:$0xff]   ;;  %v3780_v53 = vld [vmem:[#allocation10 + $0x108] ss:$12 sps:$4 sm:$0xff]   ;;  %v3785_v56 = vld [vmem:[#allocation10 + $0xf0] ss:$12 sps:$4 sm:$0xff]  }
  0x84   :  { %3349 = vmatprep.subr.bf16.mxu1 %v3776_v24  ;;  %545 = vmatprep.mubr.bf16.mxu0 %v239_v40  ;;  %v3783_v55 = vld [vmem:[#allocation10 + $0xf4] ss:$12 sps:$4 sm:$0xff]   ;;  %v3788_v57 = vld [vmem:[#allocation10 + $0xdc] ss:$12 sps:$4 sm:$0xff]   ;;  %v3790_v58 = vld [vmem:[#allocation10 + $0xd8] ss:$12 sps:$4 sm:$0xff]  }
  0x85   :  { %522 = vmatpush1.bf16.msra.mxu0 %v3746_v12  ;;  %609 = vperm.xlu1 %3731, %v601_v45   ;;  %v3793_v59 = vld [vmem:[#allocation10 + $0xc4] ss:$12 sps:$4 sm:$0xff]   ;;  %v819_v60 = vld [vmem:[#allocation8 + $0x1c8] sm:$0xff]  ;;  %v805_v39 = vld [vmem:[#allocation8 + $0x158] sm:$0xff] }
  0x86   :  { %523 = vmatprep.subr.bf16.mxu0 %v3747_v15  ;;  %606 = vperm.xlu0 %3730, %v600_v48   ;;  %v823_v61 = vld [vmem:[#allocation8 + $0x1e8] sm:$0xff]  ;;  %v809_v40 = vld [vmem:[#allocation8 + $0x178] sm:$0xff] }
  0x87   :  { %3350 = vmatpush3.bf16.msra.mxu1 %v3777_v26  ;;  %v3795_v62 = vld [vmem:[#allocation10 + $0xc0] ss:$12 sps:$4 sm:$0xff]   ;;  %v3191_v2 = vcombine.high %v819_v60, %v823_v61  ;;  %v3190_v3 = vcombine.low %v819_v60, %v823_v61  ;;  %v797_v43 = vld [vmem:[#allocation8 + $0x118] sm:$0xff]  ;;  %v3179_v45 = vcombine.high %v805_v39, %v809_v40 }
  0x88   :  { %3351 = vmatprep.subr.bf16.mxu1 %v3781_v28  ;;  %v811_v63 = vld [vmem:[#allocation8 + $0x188] sm:$0xff]  ;;  %v821_v28 = vld [vmem:[#allocation8 + $0x1d8] sm:$0xff] }
  0x89   :  { %524 = vmatpush1.bf16.msra.mxu0 %v3749_v16  ;;  %626 = vperm.xlu1 %3731, %v622_v50   ;;  %v815_v1 = vld [vmem:[#allocation8 + $0x1a8] sm:$0xff]  ;;  %v793_v50 = vld [vmem:[#allocation8 + $0xf8] sm:$0xff] }
  0x8a   :  { %525 = vmatprep.subr.bf16.mxu0 %v3750_v19  ;;  %629 = vperm.xlu0 %3730, %v623_v52   ;;  %v803_v4 = vld [vmem:[#allocation8 + $0x148] sm:$0xff]  ;;  %v3183_v6 = vcombine.high %v811_v63, %v815_v1  ;;  %v3182_v7 = vcombine.low %v811_v63, %v815_v1  ;;  %v765_v63 = vld [vmem:[#allocation8 + $0x18] sm:$0xff] }
  0x8b   :  { %3352 = vmatpush3.bf16.msra.mxu1 %v3782_v30  ;;  %v807_v5 = vld [vmem:[#allocation8 + $0x168] sm:$0xff]  ;;  %v769_v1 = vld [vmem:[#allocation8 + $0x38] sm:$0xff] }
  0x8c   :  { %3353 = vmatprep.subr.bf16.mxu1 %v3786_v31  ;;  %v795_v8 = vld [vmem:[#allocation8 + $0x108] sm:$0xff]  ;;  %v3175_v10 = vcombine.high %v803_v4, %v807_v5  ;;  %v3174_v11 = vcombine.low %v803_v4, %v807_v5  ;;  %v242_v4 = vlaneseq }
  0x8d   :  { %526 = vmatpush1.bf16.msra.mxu0 %v3752_v22  ;;  %632 = vperm.xlu1 %3731, %v624_v54   ;;  %v799_v9 = vld [vmem:[#allocation8 + $0x128] sm:$0xff]  ;;  %v785_v54 = vld [vmem:[#allocation8 + $0xb8] sm:$0xff] }
  0x8e   :  { %527 = vmatprep.subr.bf16.mxu0 %v3753_v23  ;;  %v787_v12 = vld [vmem:[#allocation8 + $0xc8] sm:$0xff]  ;;  %v3167_v14 = vcombine.high %v795_v8, %v799_v9  ;;  %v3166_v15 = vcombine.low %v795_v8, %v799_v9  ;;  %v4360_v5 = vand.u32 127, %v242_v4 }
  0x8f   :  { %3354 = vmatpush3.bf16.msra.mxu1 %v3787_v34  ;;  %v791_v13 = vld [vmem:[#allocation8 + $0xe8] sm:$0xff]  ;;  %v813_v34 = vld [vmem:[#allocation8 + $0x198] sm:$0xff] }
  0x90   :  { %3355 = vmatprep.subr.bf16.mxu1 %v3791_v35  ;;  %v779_v16 = vld [vmem:[#allocation8 + $0x88] sm:$0xff]  ;;  %v3159_v18 = vcombine.high %v787_v12, %v791_v13  ;;  %v3158_v19 = vcombine.low %v787_v12, %v791_v13  ;;  %v817_v35 = vld [vmem:[#allocation8 + $0x1b8] sm:$0xff] }
  0x91   :  { %528 = vmatpush1.bf16.msra.mxu0 %v3755_v25  ;;  %v783_v17 = vld [vmem:[#allocation8 + $0xa8] sm:$0xff]  ;;  %v3187_v41 = vcombine.high %v813_v34, %v817_v35  ;;  %v3186_v42 = vcombine.low %v813_v34, %v817_v35  ;;  %v3796_v12 = vld [vmem:[#allocation13 + $0xf8] sm:$0xff]  }
  0x92   :  { %529 = vmatprep.subr.bf16.mxu0 %v3758_v27  ;;  %v771_v20 = vld [vmem:[#allocation8 + $0x48] sm:$0xff]  ;;  %v3151_v22 = vcombine.high %v779_v16, %v783_v17  ;;  %v3150_v23 = vcombine.low %v779_v16, %v783_v17  ;;  %v3797_v13 = vld [vmem:[#allocation13 + $0xb8] sm:$0xff]  }
  0x93   :  { %3356 = vmatpush3.bf16.msra.mxu1 %v3792_v37  ;;  %v775_v21 = vld [vmem:[#allocation8 + $0x68] sm:$0xff] }
  0x94   :  { %v763_v24 = vld [vmem:[#allocation8 + $0x8] sm:$0xff]  ;;  %v3143_v26 = vcombine.high %v771_v20, %v775_v21  ;;  %v3142_v27 = vcombine.low %v771_v20, %v775_v21  ;;  %v4367_v21 = vshrl.u32 %v242_v4, 7 }
  0x95   :  { %530 = vmatpush2.bf16.msra.mxu0 %v3760_v29  ;;  %v767_v25 = vld [vmem:[#allocation8 + $0x28] sm:$0xff]  ;;  %v825_v29 = vld [vmem:[#allocation8 + $0x1f8] sm:$0xff] }
  0x96   :  { %531 = vmatprep.subr.bf16.mxu0 %v3763_v32  ;;  %589 = vmatmul.mubr.bf16.vlgmr.msra.gmra.mxu1 %v238_v47  ;;  %v3135_v30 = vcombine.high %v763_v24, %v767_v25  ;;  %v759_v31 = vld [vmem:[#allocation5] sm:$0xff]  ;;  %v760_v32 = vld [vmem:[#allocation5 + $0x8] sm:$0xff]  ;;  %v3194_v38 = vcombine.low %v821_v28, %v825_v29 }
  0x97   :  { %v4349_v37 = vpack.c.bf16 %v760_v32, %v759_v31  ;;  %v3800_v16 = vld [vmem:[#allocation13 + $0xe8] sm:$0xff]  }
  0x98   :  { %v3801_v17 = vld [vmem:[#allocation13 + $0xa8] sm:$0xff]  }
  0x99   :  { %532 = vmatpush2.bf16.msra.mxu0 %v3765_v33  ;;  %v3134_v33 = vcombine.low %v763_v24, %v767_v25 }
  0x9a   :  { %533 = vmatprep.subr.bf16.mxu0 %v3768_v36  ;;  %v3195_v36 = vcombine.high %v821_v28, %v825_v29 }
  0x9d   :  { %534 = vmatpush2.bf16.msra.mxu0 %v3770_v44  ;;  %v801_v44 = vld [vmem:[#allocation8 + $0x138] sm:$0xff] }
  0x9e   :  { %535 = vmatprep.subr.bf16.mxu0 %v3773_v46  ;;  %v3178_v46 = vcombine.low %v805_v39, %v809_v40  ;;  %v3170_v48 = vcombine.low %v797_v43, %v801_v44 }
  0xa1   :  { %536 = vmatpush2.bf16.msra.mxu0 %v3775_v49  ;;  %v789_v49 = vld [vmem:[#allocation8 + $0xd8] sm:$0xff] }
  0xa2   :  { %537 = vmatprep.subr.bf16.mxu0 %v3778_v51  ;;  %v3163_v51 = vcombine.high %v789_v49, %v793_v50  ;;  %v3162_v52 = vcombine.low %v789_v49, %v793_v50  ;;  %v818_v49 = vld [vmem:[#allocation8 + $0x1c0] sm:$0xff] }
  0xa3   :  { %v822_v50 = vld [vmem:[#allocation8 + $0x1e0] sm:$0xff] }
  0xa5   :  { %538 = vmatpush2.bf16.msra.mxu0 %v3780_v53  ;;  %v781_v53 = vld [vmem:[#allocation8 + $0x98] sm:$0xff] }
  0xa6   :  { %539 = vmatprep.subr.bf16.mxu0 %v3783_v55  ;;  %v3155_v55 = vcombine.high %v781_v53, %v785_v54 }
  0xa9   :  { %540 = vmatpush2.bf16.msra.mxu0 %v3785_v56  ;;  %v3154_v56 = vcombine.low %v781_v53, %v785_v54 }
  0xaa   :  { %541 = vmatprep.subr.bf16.mxu0 %v3788_v57  ;;  %v761_v57 = vld [vmem:[#allocation5 + $0x10] sm:$0xff] }
  0xab   :  { %v4353_v60 = vpack.c.bf16 %v761_v57, %v761_v57 }
  0xad   :  { %542 = vmatpush2.bf16.msra.mxu0 %v3790_v58  ;;  %v773_v58 = vld [vmem:[#allocation8 + $0x58] sm:$0xff] }
  0xae   :  { %543 = vmatprep.subr.bf16.mxu0 %v3793_v59  ;;  %v777_v59 = vld [vmem:[#allocation8 + $0x78] sm:$0xff] }
  0xaf   :  { %v3147_v61 = vcombine.high %v773_v58, %v777_v59 }
  0xb1   :  { %544 = vmatpush2.bf16.msra.mxu0 %v3795_v62  ;;  %v3146_v62 = vcombine.low %v773_v58, %v777_v59  ;;  %v810_v58 = vld [vmem:[#allocation8 + $0x180] sm:$0xff] }
  0xb2   :  { %1199 = vmatprep.subr.bf16.mxu0 %v3191_v2  ;;  %v3139_v2 = vcombine.high %v765_v63, %v769_v1  ;;  %v814_v59 = vld [vmem:[#allocation8 + $0x1a0] sm:$0xff] }
  0xb4   :  { %546 = vmatmul.mubr.bf16.vlgmr.msra.gmra.mxu0 %v238_v47  ;;  %v3171_v47 = vcombine.high %v797_v43, %v801_v44 }
  0xb5   :  { %1200 = vmatpush1.bf16.msra.mxu0 %v3190_v3  ;;  %1231 = vmatprep.mubr.bf16.mxu0 %v4205_v0  ;;  %v3138_v3 = vcombine.low %v765_v63, %v769_v1  ;;  %v3181_v63 = vcombine.high %v810_v58, %v814_v59  ;;  %v802_v1 = vld [vmem:[#allocation8 + $0x140] sm:$0xff] }
  0xb6   :  { %1201 = vmatprep.subr.bf16.mxu0 %v3183_v6 }
  0xb9   :  { %1202 = vmatpush1.bf16.msra.mxu0 %v3182_v7  ;;  %v4206_v7 = vmov 0.0  }
  0xba   :  { %1203 = vmatprep.subr.bf16.mxu0 %v3175_v10 }
  0xbd   :  { %1204 = vmatpush1.bf16.msra.mxu0 %v3174_v11 }
  0xbe   :  { %1205 = vmatprep.subr.bf16.mxu0 %v3167_v14  ;;  %v3798_v14 = vld [vmem:[#allocation13 + $0xf0] sm:$0xff]  }
  0xc1   :  { %1206 = vmatpush1.bf16.msra.mxu0 %v3166_v15  ;;  %v3799_v15 = vld [vmem:[#allocation13 + $0xb0] sm:$0xff]  }
  0xc2   :  { %1207 = vmatprep.subr.bf16.mxu0 %v3159_v18 }
  0xc5   :  { %1208 = vmatpush1.bf16.msra.mxu0 %v3158_v19 }
  0xc6   :  { %1209 = vmatprep.subr.bf16.mxu0 %v3151_v22  ;;  %v252_v22 = vsub.s32 2, %v4367_v21 }
  0xc9   :  { %1210 = vmatpush1.bf16.msra.mxu0 %v3150_v23  ;;  %v248_v23 = vsub.s32 1, %v4367_v21 }
  0xca   :  { %1211 = vmatprep.subr.bf16.mxu0 %v3143_v26  ;;  %v244_v26 = vsub.s32 0, %v4367_v21 }
  0xcd   :  { %1212 = vmatpush1.bf16.msra.mxu0 %v3142_v27  ;;  %v240_v27 = vld [vmem:[#allocation11] sm:$0x7] }
  0xce   :  { %1213 = vmatprep.subr.bf16.mxu0 %v3135_v30  ;;  %v253_v28 = vrot.slane %v240_v27, %v252_v22  ;;  %v249_v30 = vrot.slane %v240_v27, %v248_v23  ;;  %v762_v23 = vld [vmem:[#allocation8] sm:$0xff] }
  0xd1   :  { %1214 = vmatpush1.bf16.msra.mxu0 %v3134_v33  ;;  %v245_v33 = vrot.slane %v240_v27, %v244_v26  ;;  %v820_v27 = vld [vmem:[#allocation8 + $0x1d0] sm:$0xff] }
  0xd2   :  { %1301 = vmatprep.subr.bf16.mxu0 %v3195_v36 }
  0xd4   :  { %1232 = vmatmul.mubr.bf16.vlgmr.msra.gmra.mxu0 %v4349_v37 }
  0xd5   :  { %1302 = vmatpush1.bf16.msra.mxu0 %v3194_v38  ;;  %1241 = vmatprep.mubr.bf16.mxu0 %v4205_v0 }
  0xd6   :  { %1303 = vmatprep.subr.bf16.mxu0 %v3187_v41 }
  0xd9   :  { %1304 = vmatpush1.bf16.msra.mxu0 %v3186_v42 }
  0xda   :  { %1305 = vmatprep.subr.bf16.mxu0 %v3179_v45 }
  0xdc   :  { %1242 = vmatmul.mubr.bf16.gmra.mxu0 %v4353_v60 }
  0xdd   :  { %1306 = vmatpush1.bf16.msra.mxu0 %v3178_v46  ;;  %1333 = vmatprep.mubr.bf16.mxu0 %v4205_v0 }
  0xde   :  { %1307 = vmatprep.subr.bf16.mxu0 %v3171_v47 }
  0xe1   :  { %1308 = vmatpush1.bf16.msra.mxu0 %v3170_v48 }
  0xe2   :  { %1309 = vmatprep.subr.bf16.mxu0 %v3163_v51 }
  0xe5   :  { %1310 = vmatpush1.bf16.msra.mxu0 %v3162_v52 }
  0xe6   :  { %1311 = vmatprep.subr.bf16.mxu0 %v3155_v55  ;;  %v3189_v55 = vcombine.high %v818_v49, %v822_v50 }
  0xe9   :  { %1312 = vmatpush1.bf16.msra.mxu0 %v3154_v56 }
  0xea   :  { %1313 = vmatprep.subr.bf16.mxu0 %v3147_v61  ;;  %v3188_v61 = vcombine.low %v818_v49, %v822_v50  ;;  %v792_v49 = vld [vmem:[#allocation8 + $0xf0] sm:$0xff] }
  0xed   :  { %1314 = vmatpush1.bf16.msra.mxu0 %v3146_v62 }
  0xee   :  { %1315 = vmatprep.subr.bf16.mxu0 %v3139_v2  ;;  %v806_v2 = vld [vmem:[#allocation8 + $0x160] sm:$0xff] }
  0xef   :  { %v3173_v4 = vcombine.high %v802_v1, %v806_v2 }
  0xf1   :  { %1316 = vmatpush1.bf16.msra.mxu0 %v3138_v3  ;;  %v3180_v3 = vcombine.low %v810_v58, %v814_v59  ;;  %v772_v58 = vld [vmem:[#allocation8 + $0x50] sm:$0xff] }
  0xf2   :  { %3397 = vmatprep.subr.bf16.mxu0 %v3796_v12  ;;  %v776_v59 = vld [vmem:[#allocation8 + $0x70] sm:$0xff] }
  0xf4   :  { %1334 = vmatmul.mubr.bf16.vlgmr.msra.gmra.mxu0 %v4349_v37 }
  0xf5   :  { %1343 = vmatprep.mubr.bf16.mxu0 %v4205_v0  ;;  %3398 = vmatpush3.bf16.msra.mxu0 %v3797_v13 }
  0xf6   :  { %3399 = vmatprep.subr.bf16.mxu0 %v3798_v14  ;;  %v778_v14 = vld [vmem:[#allocation8 + $0x80] sm:$0xff] }
  0xf9   :  { %3400 = vmatpush3.bf16.msra.mxu0 %v3799_v15  ;;  %v782_v15 = vld [vmem:[#allocation8 + $0xa0] sm:$0xff] }
  0xfa   :  { %3401 = vmatprep.subr.bf16.mxu0 %v3800_v16 }
  0xfc   :  { %1344 = vmatmul.mubr.bf16.gmra.mxu0 %v4353_v60 }
  0xfd   :  { %v604_v6 = vpop.permute.xlu0 %603  ;;  %3402 = vmatpush3.bf16.msra.mxu0 %v3801_v17  ;;  %v3149_v17 = vcombine.high %v778_v14, %v782_v15 }
  0xfe   :  { %vm611_vm0 = vcmp.eq.s32.totalorder %v4360_v5, %v604_v6  ;;  %v798_v6 = vld [vmem:[#allocation8 + $0x120] sm:$0xff] }
  0xff   :  { %v3122_v8 = vsel %vm611_vm0, 1.0, %v4206_v7 }
 0x100   :  { %v610_v25 = vpop.permute.xlu1 %609 }
 0x101   :  { %v607_v9 = vpop.permute.xlu0 %606  ;;  %vm613_vm3 = vcmp.eq.s32.totalorder %v4360_v5, %v610_v25 }
 0x102   :  { %vm612_vm1 = vcmp.eq.s32.totalorder %v4360_v5, %v607_v9  ;;  %v3124_v44 = vsel %vm613_vm3, 1.0, %v4206_v7 }
 0x103   :  { %v3123_v10 = vsel %vm612_vm1, 1.0, %v4206_v7  ;;  %v621_v51 = vpack.c.bf16 %v3124_v44, %v3124_v44 }
 0x104   :  { %v620_v11 = vpack.c.bf16 %v3123_v10, %v3122_v8  ;;  %v627_v38 = vpop.permute.xlu1 %626  ;;  %v3172_v8 = vcombine.low %v802_v1, %v806_v2  ;;  %v786_v10 = vld [vmem:[#allocation8 + $0xc0] sm:$0xff]  ;;  %v764_v2 = vld [vmem:[#allocation8 + $0x10] sm:$0xff] }
 0x105   :  { %v630_v39 = vpop.permute.xlu0 %629  ;;  %vm634_vm4 = vcmp.eq.s32.totalorder %v4360_v5, %v627_v38  ;;  %v808_v38 = vld [vmem:[#allocation8 + $0x170] sm:$0xff] }
 0x106   :  { %3549 = vmatprep.mubr.msk.bf16.mxu1 %vm646_vm2, %v620_v11  ;;  %vm635_vm5 = vcmp.eq.s32.totalorder %v4360_v5, %v630_v39  ;;  %v3125_v52 = vsel %vm634_vm4, 1.0, %v4206_v7  ;;  %v790_v11 = vld [vmem:[#allocation8 + $0xe0] sm:$0xff] }
 0x107   :  { %v3126_v53 = vsel %vm635_vm5, 1.0, %v4206_v7  ;;  %v3157_v13 = vcombine.high %v786_v10, %v790_v11  ;;  %v3156_v16 = vcombine.low %v786_v10, %v790_v11  ;;  %v3802_v10 = vld [vmem:[#allocation13 + $0xe0] sm:$0xff]  }
 0x108   :  { %v633_v54 = vpop.permute.xlu1 %632  ;;  %v643_v56 = vpack.c.bf16 %v3126_v53, %v3125_v52  ;;  %v780_v53 = vld [vmem:[#allocation8 + $0x90] sm:$0xff]  ;;  %3403 = vmatprep.subr.bf16.mxu0 %v3802_v10 }
 0x109   :  { %vm636_vm6 = vcmp.eq.s32.totalorder %v4360_v5, %v633_v54  ;;  %v794_v5 = vld [vmem:[#allocation8 + $0x100] sm:$0xff]  ;;  %v784_v54 = vld [vmem:[#allocation8 + $0xb0] sm:$0xff] }
 0x10a   :  { %v3127_v57 = vsel %vm636_vm6, 1.0, %v4206_v7  ;;  %v3165_v9 = vcombine.high %v794_v5, %v798_v6  ;;  %v3164_v12 = vcombine.low %v794_v5, %v798_v6  ;;  %v3144_v5 = vcombine.low %v772_v58, %v776_v59 }
 0x10b   :  { %v644_v62 = vpack.c.bf16 %v3127_v57, %v3127_v57  ;;  %v3153_v57 = vcombine.high %v780_v53, %v784_v54 }
 0x156   :  { %v3357_v18 = vpop.f32.mrf.mxu1 }
 0x158   :  { %v3358_v19 = vpop.f32.mrf.mxu1 }
 0x159   :  { %v3359_v29 = vadd.f32 %v3358_v19, %v3357_v18  ;;  %v770_v18 = vld [vmem:[#allocation8 + $0x40] sm:$0xff] }
 0x15a   :  { %v3360_v20 = vpop.f32.mrf.mxu1  ;;  %v774_v19 = vld [vmem:[#allocation8 + $0x60] sm:$0xff] }
 0x15b   :  { %v591_v35 = vadd.f32 %v3359_v29, %v253_v28  ;;  %v3141_v22 = vcombine.high %v770_v18, %v774_v19  ;;  %v3140_v25 = vcombine.low %v770_v18, %v774_v19  ;;  %v3806_v18 = vld [vmem:[#allocation13 + $0xd0] sm:$0xff]  }
 0x15c   :  { %v3361_v24 = vpop.f32.mrf.mxu1 }
 0x15d   :  { %v3362_v31 = vadd.f32 %v3361_v24, %v3360_v20  ;;  %v3148_v20 = vcombine.low %v778_v14, %v782_v15  ;;  %v766_v24 = vld [vmem:[#allocation8 + $0x20] sm:$0xff] }
 0x15e   :  { %v3133_v26 = vcombine.high %v762_v23, %v766_v24  ;;  %v3132_v29 = vcombine.low %v762_v23, %v766_v24  ;;  %v3804_v15 = vld [vmem:[#allocation13 + $0xd8] sm:$0xff]   ;;  %v3808_v23 = vld [vmem:[#allocation13 + $0xc8] sm:$0xff]  }
 0x15f   :  { %v594_v40 = vadd.f32 %v3362_v31, %v253_v28  ;;  %v824_v28 = vld [vmem:[#allocation8 + $0x1f0] sm:$0xff] }
 0x160   :  { %v812_v31 = vld [vmem:[#allocation8 + $0x190] sm:$0xff] }
 0x161   :  { %v701_v48 = vpack.c.bf16 %v594_v40, %v591_v35  ;;  %v804_v35 = vld [vmem:[#allocation8 + $0x150] sm:$0xff] }
 0x162   :  { %v3809_v24 = vld [vmem:[#allocation13 + $0x88] sm:$0xff]  }
 0x174   :  { %v547_v32 = vpop.f32.mrf.mxu0 }
 0x175   :  { %v548_v42 = vadd.f32 %v547_v32, %v245_v33  ;;  %v816_v32 = vld [vmem:[#allocation8 + $0x1b0] sm:$0xff] }
 0x176   :  { %v549_v34 = vpop.f32.mrf.mxu0  ;;  %v3184_v40 = vcombine.low %v812_v31, %v816_v32 }
 0x177   :  { %v4373_v36 = vadd.f32 %v549_v34, %v249_v30  ;;  %v3185_v34 = vcombine.high %v812_v31, %v816_v32  ;;  %v3817_v31 = vld [vmem:[#allocation13 + $0x30] sm:$0xff]   ;;  %v3820_v32 = vld [vmem:[#allocation13 + $0x68] sm:$0xff]  }
 0x178   :  { %v551_v41 = vpop.f32.mrf.mxu0 }
 0x179   :  { %v552_v43 = vadd.f32 %v551_v41, %v245_v33  ;;  %v3192_v33 = vcombine.low %v820_v27, %v824_v28  ;;  %v3177_v41 = vcombine.high %v804_v35, %v808_v38 }
 0x17a   :  { %v553_v45 = vpop.f32.mrf.mxu0 }
 0x17b   :  { %v645_v46 = vpack.c.bf16 %v552_v43, %v548_v42  ;;  %v4378_v47 = vadd.f32 %v553_v45, %v249_v30  ;;  %v3193_v30 = vcombine.high %v820_v27, %v824_v28  ;;  %v796_v42 = vld [vmem:[#allocation8 + $0x110] sm:$0xff]  ;;  %v3176_v45 = vcombine.low %v804_v35, %v808_v38  ;;  %v3811_v27 = vld [vmem:[#allocation13 + $0x80] sm:$0xff]   ;;  %v3812_v28 = vld [vmem:[#allocation13 + $0x78] sm:$0xff]  }
 0x17c   :  { %v800_v43 = vld [vmem:[#allocation8 + $0x130] sm:$0xff]  ;;  %v3825_v35 = vld [vmem:[#allocation13 + $0x20] sm:$0xff]   ;;  %v3829_v38 = vld [vmem:[#allocation13 + $0x18] sm:$0xff]  }
 0x17d   :  { %3547 = vmatprep.subr.bf16.mxu1 %v645_v46 }
 0x17e   :  { %3548 = vmatpush3.bf16.msra.mxu1 %v645_v46  ;;  %v3169_v46 = vcombine.high %v796_v42, %v800_v43 }
 0x17f   :  { %3553 = vmatprep.subr.bf16.mxu1 %v701_v48 }
 0x181   :  { %3550 = vmatmul.mubr.msk.bf16.vlgmr.msra.gmra.mxu1 %vm646_vm2, %v621_v51  ;;  %v3168_v51 = vcombine.low %v796_v42, %v800_v43  ;;  %v3836_v42 = vld [vmem:[#allocation13 + $0x48] sm:$0xff]  }
 0x182   :  { %3554 = vmatpush3.bf16.msra.mxu1 %v701_v48  ;;  %3555 = vmatprep.mubr.msk.bf16.mxu1 %vm646_vm2, %v643_v56  ;;  %v788_v48 = vld [vmem:[#allocation8 + $0xd0] sm:$0xff] }
 0x183   :  { %1148 = vmatprep.subr.bf16.mxu1 %v3189_v55  ;;  %v3161_v52 = vcombine.high %v788_v48, %v792_v49  ;;  %v3160_v56 = vcombine.low %v788_v48, %v792_v49  ;;  %v3837_v43 = vld [vmem:[#allocation13 + $0x8] sm:$0xff]   ;;  %v3844_v48 = vld [vmem:[#allocation13 + $0x178] sm:$0xff]  }
 0x189   :  { %3556 = vmatmul.mubr.msk.bf16.vlgmr.msra.gmra.mxu1 %vm646_vm2, %v644_v62  ;;  %v3152_v62 = vcombine.low %v780_v53, %v784_v54 }
 0x18a   :  { %1149 = vmatpush1.bf16.msra.mxu1 %v3188_v61  ;;  %1180 = vmatprep.mubr.bf16.mxu1 %v4205_v0 }
 0x18b   :  { %1150 = vmatprep.subr.bf16.mxu1 %v3181_v63  ;;  %v3145_v63 = vcombine.high %v772_v58, %v776_v59 }
 0x18e   :  { %1151 = vmatpush1.bf16.msra.mxu1 %v3180_v3  ;;  %v768_v3 = vld [vmem:[#allocation8 + $0x30] sm:$0xff] }
 0x18f   :  { %1152 = vmatprep.subr.bf16.mxu1 %v3173_v4  ;;  %v3137_v6 = vcombine.high %v764_v2, %v768_v3  ;;  %v3136_v11 = vcombine.low %v764_v2, %v768_v3 }
 0x192   :  { %1153 = vmatpush1.bf16.msra.mxu1 %v3172_v8 }
 0x193   :  { %1154 = vmatprep.subr.bf16.mxu1 %v3165_v9 }
 0x194   :  { %v4389_v39 = vpop.f32.mrf.mxu0 }
 0x196   :  { %1155 = vmatpush1.bf16.msra.mxu1 %v3164_v12  ;;  %v4392_v44 = vpop.f32.mrf.mxu0  ;;  %v3803_v12 = vld [vmem:[#allocation13 + $0xa0] sm:$0xff]  }
 0x197   :  { %1156 = vmatprep.subr.bf16.mxu1 %v3157_v13  ;;  %3404 = vmatpush3.bf16.msra.mxu0 %v3803_v12  ;;  %v3818_v12 = vld [vmem:[#allocation13 + $0x1f0] sm:$0xff]  }
 0x198   :  { %v4395_v50 = vpop.f32.mrf.mxu0  ;;  %3405 = vmatprep.subr.bf16.mxu0 %v3804_v15 }
 0x19a   :  { %1157 = vmatpush1.bf16.msra.mxu1 %v3156_v16  ;;  %v4398_v55 = vpop.f32.mrf.mxu0  ;;  %v3805_v16 = vld [vmem:[#allocation13 + $0x98] sm:$0xff]  }
 0x19b   :  { %1158 = vmatprep.subr.bf16.mxu1 %v3149_v17  ;;  %3406 = vmatpush3.bf16.msra.mxu0 %v3805_v16 }
 0x19c   :  { %v4400_v61 = vpop.f32.mrf.mxu0  ;;  %3407 = vmatprep.subr.bf16.mxu0 %v3806_v18 }
 0x19e   :  { %1159 = vmatpush1.bf16.msra.mxu1 %v3148_v20  ;;  %v4402_v1 = vpop.f32.mrf.mxu0  ;;  %v3807_v20 = vld [vmem:[#allocation13 + $0x90] sm:$0xff]  }
 0x19f   :  { %1160 = vmatprep.subr.bf16.mxu1 %v3141_v22  ;;  %3408 = vmatpush3.bf16.msra.mxu0 %v3807_v20  ;;  %v3826_v20 = vld [vmem:[#allocation13 + $0x1e0] sm:$0xff]  }
 0x1a0   :  { %v1247_v4 = vpop.f32.mrf.mxu0  ;;  %3409 = vmatprep.subr.bf16.mxu0 %v3808_v23 }
 0x1a2   :  { %1161 = vmatpush1.bf16.msra.mxu1 %v3140_v25  ;;  %v1248_v8 = vpop.f32.mrf.mxu0 }
 0x1a3   :  { %1162 = vmatprep.subr.bf16.mxu1 %v3133_v26  ;;  %3410 = vmatpush3.bf16.msra.mxu0 %v3809_v24  ;;  %v3810_v26 = vld [vmem:[#allocation13 + $0xc0] sm:$0xff]  }
 0x1a4   :  { %3411 = vmatprep.subr.bf16.mxu0 %v3810_v26  ;;  %v3827_v24 = vld [vmem:[#allocation13 + $0x1a0] sm:$0xff]   ;;  %v3834_v26 = vld [vmem:[#allocation13 + $0x1d0] sm:$0xff]  }
 0x1a6   :  { %1163 = vmatpush1.bf16.msra.mxu1 %v3132_v29 }
 0x1a7   :  { %1250 = vmatprep.subr.bf16.mxu1 %v3193_v30  ;;  %3412 = vmatpush3.bf16.msra.mxu0 %v3811_v27  ;;  %v3816_v30 = vld [vmem:[#allocation13 + $0x70] sm:$0xff]  }
 0x1a9   :  { %1181 = vmatmul.mubr.bf16.vlgmr.msra.gmra.mxu1 %v4349_v37 }
 0x1aa   :  { %1251 = vmatpush1.bf16.msra.mxu1 %v3192_v33  ;;  %1190 = vmatprep.mubr.bf16.mxu1 %v4205_v0  ;;  %v3821_v33 = vld [vmem:[#allocation13 + $0x28] sm:$0xff]  }
 0x1ab   :  { %1252 = vmatprep.subr.bf16.mxu1 %v3185_v34  ;;  %v3824_v34 = vld [vmem:[#allocation13 + $0x60] sm:$0xff]  }
 0x1ae   :  { %1253 = vmatpush1.bf16.msra.mxu1 %v3184_v40  ;;  %v3832_v40 = vld [vmem:[#allocation13 + $0x50] sm:$0xff]  }
 0x1af   :  { %1254 = vmatprep.subr.bf16.mxu1 %v3177_v41  ;;  %v3833_v41 = vld [vmem:[#allocation13 + $0x10] sm:$0xff]  }
 0x1b1   :  { %1191 = vmatmul.mubr.bf16.gmra.mxu1 %v4353_v60 }
 0x1b2   :  { %1255 = vmatpush1.bf16.msra.mxu1 %v3176_v45  ;;  %1282 = vmatprep.mubr.bf16.mxu1 %v4205_v0  ;;  %v3840_v45 = vld [vmem:[#allocation13 + $0x40] sm:$0xff]  }
 0x1b3   :  { %1256 = vmatprep.subr.bf16.mxu1 %v3169_v46  ;;  %v3841_v46 = vld [vmem:[#allocation13] sm:$0xff]  }
 0x1b4   :  { %v4404_v9 = vpop.f32.mrf.mxu0 }
 0x1b6   :  { %1257 = vmatpush1.bf16.msra.mxu1 %v3168_v51  ;;  %v4406_v13 = vpop.f32.mrf.mxu0 }
 0x1b7   :  { %1258 = vmatprep.subr.bf16.mxu1 %v3161_v52 }
 0x1b8   :  { %v4408_v14 = vpop.f32.mrf.mxu0 }
 0x1ba   :  { %1259 = vmatpush1.bf16.msra.mxu1 %v3160_v56  ;;  %v4410_v17 = vpop.f32.mrf.mxu0 }
 0x1bb   :  { %1260 = vmatprep.subr.bf16.mxu1 %v3153_v57 }
 0x1bc   :  { %v4414_v19 = vpop.f32.mrf.mxu0 }
 0x1be   :  { %1261 = vmatpush1.bf16.msra.mxu1 %v3152_v62  ;;  %v4416_v22 = vpop.f32.mrf.mxu0 }
 0x1bf   :  { %1262 = vmatprep.subr.bf16.mxu1 %v3145_v63 }
 0x1c0   :  { %v1349_v25 = vpop.f32.mrf.mxu0 }
 0x1c1   :  { %v3830_v25 = vld [vmem:[#allocation13 + $0x1d8] sm:$0xff]  }
 0x1c2   :  { %1263 = vmatpush1.bf16.msra.mxu1 %v3144_v5  ;;  %v1350_v29 = vpop.f32.mrf.mxu0 }
 0x1c3   :  { %1264 = vmatprep.subr.bf16.mxu1 %v3137_v6  ;;  %v3839_v29 = vld [vmem:[#allocation13 + $0x188] sm:$0xff]  }
 0x1c6   :  { %1265 = vmatpush1.bf16.msra.mxu1 %v3136_v11  ;;  %v3815_v11 = vld [vmem:[#allocation13 + $0x1b8] sm:$0xff]  }
 0x1c7   :  { %3369 = vmatprep.subr.bf16.mxu1 %v3812_v28  ;;  %v3838_v28 = vld [vmem:[#allocation13 + $0x1c8] sm:$0xff]  }
 0x1c9   :  { %1283 = vmatmul.mubr.bf16.vlgmr.msra.gmra.mxu1 %v4349_v37  ;;  %v3813_v37 = vld [vmem:[#allocation13 + $0x38] sm:$0xff]  }
 0x1ca   :  { %1292 = vmatprep.mubr.bf16.mxu1 %v4205_v0  ;;  %3370 = vmatpush3.bf16.msra.mxu1 %v3813_v37  ;;  %v3814_v0 = vld [vmem:[#allocation13 + $0x1f8] sm:$0xff]  }
 0x1cb   :  { %3453 = vmatprep.subr.bf16.mxu0 %v3814_v0  ;;  %3371 = vmatprep.subr.bf16.mxu1 %v3816_v30  ;;  %v3842_v0 = vld [vmem:[#allocation13 + $0x1c0] sm:$0xff]  }
 0x1ce   :  { %3372 = vmatpush3.bf16.msra.mxu1 %v3817_v31 }
 0x1cf   :  { %3373 = vmatprep.subr.bf16.mxu1 %v3820_v32 }
 0x1d1   :  { %1293 = vmatmul.mubr.bf16.gmra.mxu1 %v4353_v60  ;;  %v3828_v60 = vld [vmem:[#allocation13 + $0x58] sm:$0xff]  }
 0x1d2   :  { %3374 = vmatpush3.bf16.msra.mxu1 %v3821_v33 }
 0x1d3   :  { %3375 = vmatprep.subr.bf16.mxu1 %v3824_v34  ;;  %v3843_v34 = vld [vmem:[#allocation13 + $0x180] sm:$0xff]  }
 0x1d6   :  { %3376 = vmatpush3.bf16.msra.mxu1 %v3825_v35 }
 0x1d7   :  { %3377 = vmatprep.subr.bf16.mxu1 %v3828_v60 }
 0x1da   :  { %3378 = vmatpush3.bf16.msra.mxu1 %v3829_v38 }
 0x1db   :  { %3379 = vmatprep.subr.bf16.mxu1 %v3832_v40 }
 0x1de   :  { %3380 = vmatpush3.bf16.msra.mxu1 %v3833_v41 }
 0x1df   :  { %3381 = vmatprep.subr.bf16.mxu1 %v3836_v42  ;;  %v3845_v42 = vld [vmem:[#allocation13 + $0x138] sm:$0xff]  }
 0x1e2   :  { %3382 = vmatpush3.bf16.msra.mxu1 %v3837_v43 }
 0x1e3   :  { %3383 = vmatprep.subr.bf16.mxu1 %v3840_v45 }
 0x1e6   :  { %3384 = vmatpush3.bf16.msra.mxu1 %v3841_v46 }
 0x1e7   :  { %3425 = vmatprep.subr.bf16.mxu1 %v3844_v48  ;;  %v3846_v48 = vld [vmem:[#allocation13 + $0x170] sm:$0xff]  }
 0x241   :  { %v3551_v49 = vpop.f32.mrf.mxu1 }
 0x243   :  { %v687_v51 = vpop.f32.mrf.mxu1 }
 0x245   :  { %v3552_v52 = vpop.f32.mrf.mxu1 }
 0x247   :  { %v690_v53 = vpop.f32.mrf.mxu1 }
 0x249   :  { %v3557_v54 = vpop.f32.mrf.mxu1 }
 0x24a   :  { %v4419_v57 = vmul.f32 %v3557_v54, %v3551_v49 }
 0x24b   :  { %v742_v56 = vpop.f32.mrf.mxu1 }
 0x24c   :  { %v4421_v59 = vmul.f32 %v742_v56, %v687_v51  ;;  %v1371_v2 = vmul.f32 %v4402_v1, %v4419_v57  ;;  %v3819_v1 = vld [vmem:[#allocation13 + $0x1b0] sm:$0xff]   ;;  %v1375_v40 = vmul.f32 %v4416_v22, %v4419_v57  ;;  %v3848_v56 = vld [vmem:[#allocation13 + $0x168] sm:$0xff]  }
 0x24d   :  { %v3558_v58 = vpop.f32.mrf.mxu1  ;;  %v3847_v22 = vld [vmem:[#allocation13 + $0x130] sm:$0xff]  }
 0x24e   :  { %v1355_v3 = vmul.f32 %v4392_v44, %v4421_v59  ;;  %v1354_v5 = vmul.f32 %v4389_v39, %v4421_v59  ;;  %v1515_v15 = vpack.c.bf16 %v1371_v2, %v1371_v2  ;;  %v3822_v44 = vld [vmem:[#allocation13 + $0x1e8] sm:$0xff]   ;;  %v1359_v16 = vmul.f32 %v4406_v13, %v4421_v59 }
 0x24f   :  { %v745_v62 = vpop.f32.mrf.mxu1  ;;  %v1358_v46 = vmul.f32 %v4404_v9, %v4421_v59  ;;  %v1374_v58 = vmul.f32 %v4414_v19, %v4419_v57  ;;  %v3856_v19 = vld [vmem:[#allocation13 + $0x148] sm:$0xff]  }
 0x250   :  { %v4423_v63 = vmul.f32 %v745_v62, %v690_v53  ;;  %v3849_v62 = vld [vmem:[#allocation13 + $0x128] sm:$0xff]  }
 0x252   :  { %v1363_v4 = vmul.f32 %v4398_v55, %v4423_v63  ;;  %v1362_v6 = vmul.f32 %v4395_v50, %v4423_v63  ;;  %v1370_v55 = vmul.f32 %v4400_v61, %v4419_v57  ;;  %v1367_v39 = vmul.f32 %v4410_v17, %v4423_v63  ;;  %v3823_v50 = vld [vmem:[#allocation13 + $0x1a8] sm:$0xff]   ;;  %v3831_v61 = vld [vmem:[#allocation13 + $0x198] sm:$0xff]   ;;  %v3835_v17 = vld [vmem:[#allocation13 + $0x190] sm:$0xff]  }
 0x253   :  { %v1366_v38 = vmul.f32 %v4408_v14, %v4423_v63  ;;  %v1519_v14 = vpack.c.bf16 %v1375_v40, %v1375_v40 }
 0x254   :  { %v1507_v8 = vpack.c.bf16 %v1363_v4, %v1355_v3  ;;  %v1506_v10 = vpack.c.bf16 %v1362_v6, %v1354_v5  ;;  %v1514_v18 = vpack.c.bf16 %v1370_v55, %v1370_v55  ;;  %v1511_v23 = vpack.c.bf16 %v1367_v39, %v1359_v16  ;;  %v3850_v3 = vld [vmem:[#allocation13 + $0x160] sm:$0xff]   ;;  %v3852_v6 = vld [vmem:[#allocation13 + $0x158] sm:$0xff]  }
 0x255   :  { %v1510_v51 = vpack.c.bf16 %v1366_v38, %v1358_v46  ;;  %v1518_v4 = vpack.c.bf16 %v1374_v58, %v1374_v58  ;;  %v3851_v5 = vld [vmem:[#allocation13 + $0x120] sm:$0xff]  }
 0x256   :  { %1984 = vmatprep.mubr.bf16.mxu0 %v1507_v8  ;;  %v3853_v8 = vld [vmem:[#allocation13 + $0x118] sm:$0xff]   ;;  %v3859_v16 = vld [vmem:[#allocation13 + $0x100] sm:$0xff]  }
 0x257   :  { %1985 = vmatmul.mubr.bf16.vlgmr.msra.gmra.mxu0 %v1506_v10  ;;  %v3854_v10 = vld [vmem:[#allocation13 + $0x150] sm:$0xff]  }
 0x258   :  { %3454 = vmatpush3.bf16.msra.mxu0 %v3815_v11  ;;  %1992 = vmatprep.mubr.bf16.mxu0 %v1515_v15  ;;  %v3855_v11 = vld [vmem:[#allocation13 + $0x110] sm:$0xff]   ;;  %v3857_v15 = vld [vmem:[#allocation13 + $0x108] sm:$0xff]  }
 0x259   :  { %3455 = vmatprep.subr.bf16.mxu0 %v3818_v12 }
 0x25c   :  { %3456 = vmatpush3.bf16.msra.mxu0 %v3819_v1 }
 0x25d   :  { %3457 = vmatprep.subr.bf16.mxu0 %v3822_v44  ;;  %v3858_v44 = vld [vmem:[#allocation13 + $0x140] sm:$0xff]  }
 0x25f   :  { %1993 = vmatmul.mubr.bf16.gmra.mxu0 %v1514_v18 }
 0x260   :  { %3458 = vmatpush3.bf16.msra.mxu0 %v3823_v50  ;;  %2080 = vmatprep.mubr.bf16.mxu0 %v1511_v23 }
 0x261   :  { %3459 = vmatprep.subr.bf16.mxu0 %v3826_v20 }
 0x264   :  { %3460 = vmatpush3.bf16.msra.mxu0 %v3827_v24 }
 0x265   :  { %3461 = vmatprep.subr.bf16.mxu0 %v3830_v25 }
 0x268   :  { %3462 = vmatpush3.bf16.msra.mxu0 %v3831_v61 }
 0x269   :  { %v1182_v27 = vpop.f32.mrf.mxu1  ;;  %3463 = vmatprep.subr.bf16.mxu0 %v3834_v26 }
 0x26a   :  { %v1352_v35 = vmul.f32 %v1182_v27, %v4421_v59 }
 0x26b   :  { %v1184_v13 = vpop.f32.mrf.mxu1 }
 0x26c   :  { %3464 = vmatpush3.bf16.msra.mxu0 %v3835_v17  ;;  %v1353_v32 = vmul.f32 %v1184_v13, %v4421_v59 }
 0x26d   :  { %v1186_v37 = vpop.f32.mrf.mxu1  ;;  %3465 = vmatprep.subr.bf16.mxu0 %v3838_v28 }
 0x26e   :  { %v1360_v30 = vmul.f32 %v1186_v37, %v4423_v63  ;;  %v3861_v37 = vld [vmem:[#allocation14 + $0x30] sm:$0xff]  }
 0x26f   :  { %v1188_v31 = vpop.f32.mrf.mxu1 }
 0x270   :  { %v1361_v33 = vmul.f32 %v1188_v31, %v4423_v63  ;;  %3466 = vmatpush3.bf16.msra.mxu0 %v3839_v29  ;;  %v1504_v43 = vpack.c.bf16 %v1360_v30, %v1352_v35  ;;  %v3864_v30 = vld [vmem:[#allocation14 + $0x18] sm:$0xff]   ;;  %v3865_v31 = vld [vmem:[#allocation14 + $0x10] sm:$0xff]  }
 0x271   :  { %v1192_v60 = vpop.f32.mrf.mxu1  ;;  %3467 = vmatprep.subr.bf16.mxu0 %v3842_v0  ;;  %v3862_v0 = vld [vmem:[#allocation14 + $0x28] sm:$0xff]  }
 0x272   :  { %v1505_v41 = vpack.c.bf16 %v1361_v33, %v1353_v32  ;;  %v1368_v54 = vmul.f32 %v1192_v60, %v4419_v57 }
 0x273   :  { %v1194_v45 = vpop.f32.mrf.mxu1 }
 0x274   :  { %v1369_v49 = vmul.f32 %v1194_v45, %v4419_v57  ;;  %1936 = vmatprep.mubr.bf16.mxu1 %v1505_v41  ;;  %3468 = vmatpush3.bf16.msra.mxu0 %v3843_v34  ;;  %v1512_v2 = vpack.c.bf16 %v1368_v54, %v1368_v54 }
 0x275   :  { %1937 = vmatmul.mubr.bf16.vlgmr.msra.gmra.mxu1 %v1504_v43  ;;  %v1196_v52 = vpop.f32.mrf.mxu1  ;;  %3567 = vmatprep.subr.bf16.mxu0 %v4206_v7 }
 0x276   :  { %v1513_v53 = vpack.c.bf16 %v1369_v49, %v1369_v49  ;;  %3426 = vmatpush3.bf16.msra.mxu1 %v3845_v42 }
 0x277   :  { %2081 = vmatmul.mubr.bf16.vlgmr.msra.gmra.mxu0 %v1510_v51  ;;  %3427 = vmatprep.subr.bf16.mxu1 %v3846_v48  ;;  %v1197_v9 = vpop.f32.mrf.mxu1 }
 0x278   :  { %1944 = vmatprep.mubr.bf16.mxu1 %v1513_v53  ;;  %2088 = vmatprep.mubr.bf16.mxu0 %v1519_v14 }
 0x27a   :  { %3428 = vmatpush3.bf16.msra.mxu1 %v3847_v22 }
 0x27b   :  { %3429 = vmatprep.subr.bf16.mxu1 %v3848_v56 }
 0x27d   :  { %1945 = vmatmul.mubr.bf16.gmra.mxu1 %v1512_v2 }
 0x27e   :  { %3430 = vmatpush3.bf16.msra.mxu1 %v3849_v62 }
 0x27f   :  { %2089 = vmatmul.mubr.bf16.gmra.mxu0 %v1518_v4  ;;  %3431 = vmatprep.subr.bf16.mxu1 %v3850_v3 }
 0x280   :  { %3583 = vmatprep.mubr.msk.bf16.mxu0 %vm4207_vm7, %v4206_v7 }
 0x282   :  { %3432 = vmatpush3.bf16.msra.mxu1 %v3851_v5 }
 0x283   :  { %3433 = vmatprep.subr.bf16.mxu1 %v3852_v6 }
 0x286   :  { %3434 = vmatpush3.bf16.msra.mxu1 %v3853_v8 }
 0x287   :  { %3435 = vmatprep.subr.bf16.mxu1 %v3854_v10 }
 0x289   :  { %v1284_v12 = vpop.f32.mrf.mxu1 }
 0x28a   :  { %3436 = vmatpush3.bf16.msra.mxu1 %v3855_v11  ;;  %v1356_v39 = vmul.f32 %v1284_v12, %v4421_v59 }
 0x28b   :  { %v1286_v1 = vpop.f32.mrf.mxu1  ;;  %3437 = vmatprep.subr.bf16.mxu1 %v3856_v19 }
 0x28c   :  { %v1357_v20 = vmul.f32 %v1286_v1, %v4421_v59 }
 0x28d   :  { %v1288_v55 = vpop.f32.mrf.mxu1 }
 0x28e   :  { %v1364_v50 = vmul.f32 %v1288_v55, %v4423_v63  ;;  %3438 = vmatpush3.bf16.msra.mxu1 %v3857_v15 }
 0x28f   :  { %v1290_v18 = vpop.f32.mrf.mxu1  ;;  %3439 = vmatprep.subr.bf16.mxu1 %v3858_v44 }
 0x290   :  { %v1508_v23 = vpack.c.bf16 %v1364_v50, %v1356_v39  ;;  %v1365_v24 = vmul.f32 %v1290_v18, %v4423_v63  ;;  %v3860_v63 = vld [vmem:[#allocation14 + $0x38] sm:$0xff]  }
 0x291   :  { %v1294_v25 = vpop.f32.mrf.mxu1  ;;  %3568 = vmatpush3.bf16.msra.mxu0 %v3860_v63  ;;  %v3260_v63 = vld [vmem:[#allocation7] ss:$0 sm:$0xff] }
 0x292   :  { %v1509_v61 = vpack.c.bf16 %v1365_v24, %v1357_v20  ;;  %3440 = vmatpush3.bf16.msra.mxu1 %v3859_v16  ;;  %v1372_v13 = vmul.f32 %v1294_v25, %v4419_v57  ;;  %3569 = vmatprep.subr.bf16.mxu0 %v4206_v7  ;;  %vm2104_vm9 = vcmp.eq.s32.totalorder %v4367_v21, %v3260_v63 }
 0x293   :  { %v1296_v26 = vpop.f32.mrf.mxu1  ;;  %3559 = vmatprep.subr.bf16.mxu1 %v4206_v7 }
 0x294   :  { %v1373_v17 = vmul.f32 %v1296_v26, %v4419_v57  ;;  %2032 = vmatprep.mubr.bf16.mxu1 %v1509_v61  ;;  %v1516_v59 = vpack.c.bf16 %v1372_v13, %v1372_v13  ;;  %v3863_v57 = vld [vmem:[#allocation14 + $0x20] sm:$0xff]  }
 0x295   :  { %v1298_v27 = vpop.f32.mrf.mxu1  ;;  %2033 = vmatmul.mubr.bf16.vlgmr.msra.gmra.mxu1 %v1508_v23  ;;  %3570 = vmatpush3.bf16.msra.mxu0 %v3861_v37 }
 0x296   :  { %v1517_v28 = vpack.c.bf16 %v1373_v17, %v1373_v17  ;;  %3571 = vmatprep.subr.bf16.mxu0 %v4206_v7 }
 0x297   :  { %v1299_v29 = vpop.f32.mrf.mxu1 }
 0x298   :  { %2040 = vmatprep.mubr.bf16.mxu1 %v1517_v28  ;;  %v2098_v29 = vadd.s32 8, %v4367_v21  ;;  %v3867_v21 = vld [vmem:[#allocation14] sm:$0xff]  }
 0x299   :  { %3572 = vmatpush3.bf16.msra.mxu0 %v3862_v0 }
 0x29a   :  { %3573 = vmatprep.subr.bf16.mxu0 %v4206_v7  ;;  %vm2105_vm10 = vcmp.eq.s32.totalorder %v2098_v29, %v3260_v63 }
 0x29d   :  { %2041 = vmatmul.mubr.bf16.gmra.mxu1 %v1516_v59  ;;  %3574 = vmatpush3.bf16.msra.mxu0 %v3863_v57 }
 0x29e   :  { %3563 = vmatprep.mubr.msk.bf16.mxu1 %vm4207_vm7, %v4206_v7  ;;  %3575 = vmatprep.subr.bf16.mxu0 %v4206_v7 }
 0x2a1   :  { %3576 = vmatpush3.bf16.msra.mxu0 %v3864_v30  ;;  %v3261_v30 = vsel %vm2104_vm9, 1.0, %v4206_v7 }
 0x2a2   :  { %3577 = vmatprep.subr.bf16.mxu0 %v4206_v7 }
 0x2a5   :  { %3578 = vmatpush3.bf16.msra.mxu0 %v3865_v31  ;;  %v3262_v31 = vsel %vm2105_vm10, 1.0, %v4206_v7 }
 0x2a6   :  { %3579 = vmatprep.subr.bf16.mxu0 %v4206_v7 }
 0x317   :  { %v3413_v32 = vpop.f32.mrf.mxu0 }
 0x319   :  { %v3414_v33 = vpop.f32.mrf.mxu0 }
 0x31a   :  { %v3415_v34 = vadd.f32 %v3414_v33, %v3413_v32  ;;  %v2110_v32 = vpack.c.bf16 %v3262_v31, %v3261_v30  ;;  %v3866_v33 = vld [vmem:[#allocation14 + $0x8] sm:$0xff]  }
 0x31b   :  { %v3416_v35 = vpop.f32.mrf.mxu0  ;;  %3580 = vmatpush3.bf16.msra.mxu0 %v3866_v33  ;;  %v3884_v33 = vld [vmem:[#allocation16 + $0x38] sm:$0xff]  }
 0x31c   :  { %3581 = vmatprep.subr.bf16.mxu0 %v4206_v7 }
 0x31d   :  { %v3417_v60 = vpop.f32.mrf.mxu0 }
 0x31e   :  { %v3418_v38 = vadd.f32 %v3417_v60, %v3416_v35 }
 0x31f   :  { %v3419_v40 = vpop.f32.mrf.mxu0  ;;  %3582 = vmatpush3.bf16.msra.mxu0 %v3867_v21  ;;  %v3885_v21 = vld [vmem:[#allocation16 + $0x30] sm:$0xff]  }
 0x320   :  { %3607 = vmatprep.subr.bf16.mxu0 %v4206_v7 }
 0x321   :  { %v3420_v41 = vpop.f32.mrf.mxu0 }
 0x322   :  { %v3421_v50 = vadd.f32 %v3420_v41, %v3419_v40 }
 0x323   :  { %v3422_v42 = vpop.f32.mrf.mxu0 }
 0x325   :  { %v3423_v43 = vpop.f32.mrf.mxu0 }
 0x326   :  { %v3868_v43 = vld [vmem:[#allocation14 + $0x78] sm:$0xff]  }
 0x335   :  { %v3385_v45 = vpop.f32.mrf.mxu1 }
 0x337   :  { %v3386_v46 = vpop.f32.mrf.mxu1  ;;  %v3469_v48 = vpop.f32.mrf.mxu0 }
 0x338   :  { %v3387_v5 = vadd.f32 %v3386_v46, %v3385_v45  ;;  %v3869_v45 = vld [vmem:[#allocation14 + $0x70] sm:$0xff]   ;;  %v3872_v46 = vld [vmem:[#allocation14 + $0x58] sm:$0xff]  }
 0x339   :  { %v3388_v49 = vpop.f32.mrf.mxu1  ;;  %v3470_v51 = vpop.f32.mrf.mxu0 }
 0x33a   :  { %v1987_v19 = vadd.f32 %v3415_v34, %v3387_v5  ;;  %v3471_v16 = vadd.f32 %v3470_v51, %v3469_v48  ;;  %v3873_v48 = vld [vmem:[#allocation14 + $0x50] sm:$0xff]   ;;  %v3875_v51 = vld [vmem:[#allocation14 + $0x40] sm:$0xff]  }
 0x33b   :  { %v3389_v52 = vpop.f32.mrf.mxu1  ;;  %v3472_v14 = vpop.f32.mrf.mxu0 }
 0x33c   :  { %v3390_v8 = vadd.f32 %v3389_v52, %v3388_v49  ;;  %v3874_v49 = vld [vmem:[#allocation14 + $0x48] sm:$0xff]   ;;  %v3264_v52 = vld [vmem:[%s4626_s10] ss:$0 sm:$0xff] }
 0x33d   :  { %v3391_v53 = vpop.f32.mrf.mxu1  ;;  %v3473_v22 = vpop.f32.mrf.mxu0 }
 0x33e   :  { %v1990_v15 = vadd.f32 %v3418_v38, %v3390_v8  ;;  %v3474_v18 = vadd.f32 %v3473_v22, %v3472_v14 }
 0x33f   :  { %v3392_v54 = vpop.f32.mrf.mxu1  ;;  %v3475_v56 = vpop.f32.mrf.mxu0 }
 0x340   :  { %v3393_v1 = vadd.f32 %v3392_v54, %v3391_v53 }
 0x341   :  { %v3394_v9 = vpop.f32.mrf.mxu1  ;;  %v3476_v58 = vpop.f32.mrf.mxu0 }
 0x342   :  { %v1995_v24 = vadd.f32 %v3421_v50, %v3393_v1  ;;  %v3477_v27 = vadd.f32 %v3476_v58, %v3475_v56  ;;  %v3878_v1 = vld [vmem:[%s4627_s11 + $0x28] sm:$0xff]  }
 0x343   :  { %v3395_v62 = vpop.f32.mrf.mxu1  ;;  %v3478_v2 = vpop.f32.mrf.mxu0  ;;  %v3882_v50 = vld [vmem:[%s4627_s11 + $0x8] sm:$0xff]  }
 0x345   :  { %v3479_v3 = vpop.f32.mrf.mxu0 }
 0x355   :  { %v3441_v4 = vpop.f32.mrf.mxu1 }
 0x357   :  { %v3442_v6 = vpop.f32.mrf.mxu1 }
 0x358   :  { %v3443_v10 = vadd.f32 %v3442_v6, %v3441_v4 }
 0x359   :  { %v3444_v11 = vpop.f32.mrf.mxu1 }
 0x35a   :  { %v2035_v44 = vadd.f32 %v3443_v10, %v1987_v19 }
 0x35b   :  { %v3445_v12 = vpop.f32.mrf.mxu1 }
 0x35c   :  { %v3446_v55 = vadd.f32 %v3445_v12, %v3444_v11  ;;  %v2083_v25 = vadd.f32 %v3471_v16, %v2035_v44  ;;  %v3876_v12 = vld [vmem:[%s4627_s11 + $0x38] sm:$0xff]   ;;  %v3879_v44 = vld [vmem:[%s4627_s11 + $0x20] sm:$0xff]  }
 0x35d   :  { %v3447_v39 = vpop.f32.mrf.mxu1  ;;  %v3883_v16 = vld [vmem:[%s4627_s11] sm:$0xff]  }
 0x35e   :  { %v2038_v20 = vadd.f32 %v3446_v55, %v1990_v15  ;;  %v3877_v15 = vld [vmem:[%s4627_s11 + $0x30] sm:$0xff]   ;;  %v3880_v55 = vld [vmem:[%s4627_s11 + $0x18] sm:$0xff]  }
 0x35f   :  { %v3448_v23 = vpop.f32.mrf.mxu1 }
 0x360   :  { %v2086_v61 = vadd.f32 %v3474_v18, %v2038_v20  ;;  %v3449_v26 = vadd.f32 %v3448_v23, %v3447_v39  ;;  %v3881_v39 = vld [vmem:[%s4627_s11 + $0x10] sm:$0xff]   ;;  %v3275_v18 = vld [vmem:[%s4626_s10 + $0x1] ss:$0 sm:$0xff] }
 0x361   :  { %v3450_v17 = vpop.f32.mrf.mxu1 }
 0x362   :  { %v2111_v28 = vpack.c.bf16 %v2086_v61, %v2083_v25  ;;  %v2043_v13 = vadd.f32 %v3449_v26, %v1995_v24 }
 0x363   :  { %v3451_v59 = vpop.f32.mrf.mxu1 }
 0x364   :  { %v2091_v37 = vadd.f32 %v3477_v27, %v2043_v13 }
 0x366   :  { %v2112_v0 = vpack.c.bf16 %v2091_v37, %v2091_v37 }
 0x368   :  { %v2119_v57 = vsel %vm2117_vm8, %v2112_v0, 0 }
 0x369   :  { %3560 = vmatpush3.bf16.msra.mxu1 %v2119_v57 }
 0x36a   :  { %3561 = vmatprep.subr.bf16.mxu1 %v4206_v7 }
 0x36d   :  { %3562 = vmatpush3.bf16.msra.mxu1 %v2111_v28 }
 0x36e   :  { %3587 = vmatprep.subr.bf16.mxu1 %v4206_v7 }
 0x370   :  { %3564 = vmatmul.mubr.msk.bf16.vlgmr.msra.gmra.mxu1 %vm2113_vm11, %v2110_v32 }
 0x371   :  { %3603 = vmatprep.mubr.msk.bf16.mxu1 %vm4207_vm7, %v4206_v7  ;;  %3588 = vmatpush3.bf16.msra.mxu1 %v3868_v43 }
 0x372   :  { %3589 = vmatprep.subr.bf16.mxu1 %v4206_v7 }
 0x375   :  { %3590 = vmatpush3.bf16.msra.mxu1 %v3869_v45 }
 0x376   :  { %3591 = vmatprep.subr.bf16.mxu1 %v4206_v7 }
 0x430   :  { %v2155_v34 = vpop.f32.mrf.mxu1 }
 0x431   :  { %v4484_v38 = vadd.f32 %v2155_v34, %v4373_v36  ;;  %v3870_v36 = vld [vmem:[#allocation14 + $0x68] sm:$0xff]  }
 0x432   :  { %v3565_v35 = vpop.f32.mrf.mxu1  ;;  %3592 = vmatpush3.bf16.msra.mxu1 %v3870_v36  ;;  %v3886_v34 = vld [vmem:[#allocation16 + $0x28] sm:$0xff]  }
 0x433   :  { %3593 = vmatprep.subr.bf16.mxu1 %v4206_v7  ;;  %v3887_v35 = vld [vmem:[#allocation16 + $0x20] sm:$0xff]  }
 0x434   :  { %v2158_v60 = vpop.f32.mrf.mxu1 }
 0x435   :  { %v4487_v40 = vadd.f32 %v2158_v60, %v4378_v47  ;;  %v3871_v47 = vld [vmem:[#allocation14 + $0x60] sm:$0xff]   ;;  %v3888_v60 = vld [vmem:[#allocation16 + $0x18] sm:$0xff]  }
 0x436   :  { %v3566_v41 = vpop.f32.mrf.mxu1  ;;  %3594 = vmatpush3.bf16.msra.mxu1 %v3871_v47 }
 0x437   :  { %v2178_v42 = vpack.c.bf16 %v4487_v40, %v4484_v38  ;;  %3595 = vmatprep.subr.bf16.mxu1 %v4206_v7  ;;  %v3891_v41 = vld [vmem:[#allocation16] sm:$0xff]  }
 0x439   :  { %3584 = vmatmul.mubr.bf16.vlgmr.msra.gmra.mxu0 %v2178_v42  ;;  %v3286_v42 = vld [vmem:[%s4628_s12] ss:$0 sm:$0xff] }
 0x43a   :  { %3623 = vmatprep.mubr.msk.bf16.mxu0 %vm4207_vm7, %v4206_v7  ;;  %3596 = vmatpush3.bf16.msra.mxu1 %v3872_v46 }
 0x43b   :  { %3597 = vmatprep.subr.bf16.mxu1 %v4206_v7  ;;  %3608 = vmatpush3.bf16.msra.mxu0 %v3876_v12  ;;  %v3897_v12 = vld [vmem:[#allocation16 + $0x50] sm:$0xff]  }
 0x43c   :  { %3609 = vmatprep.subr.bf16.mxu0 %v4206_v7 }
 0x43e   :  { %3598 = vmatpush3.bf16.msra.mxu1 %v3873_v48 }
 0x43f   :  { %3599 = vmatprep.subr.bf16.mxu1 %v4206_v7  ;;  %3610 = vmatpush3.bf16.msra.mxu0 %v3877_v15  ;;  %v3898_v15 = vld [vmem:[#allocation16 + $0x48] sm:$0xff]  }
 0x440   :  { %3611 = vmatprep.subr.bf16.mxu0 %v4206_v7 }
 0x442   :  { %3600 = vmatpush3.bf16.msra.mxu1 %v3874_v49 }
 0x443   :  { %3601 = vmatprep.subr.bf16.mxu1 %v4206_v7  ;;  %3612 = vmatpush3.bf16.msra.mxu0 %v3878_v1  ;;  %v3899_v1 = vld [vmem:[#allocation16 + $0x40] sm:$0xff]  }
 0x444   :  { %3613 = vmatprep.subr.bf16.mxu0 %v4206_v7 }
 0x446   :  { %3602 = vmatpush3.bf16.msra.mxu1 %v3875_v51 }
 0x447   :  { %3627 = vmatprep.subr.bf16.mxu1 %v4206_v7  ;;  %3614 = vmatpush3.bf16.msra.mxu0 %v3879_v44  ;;  %v3297_v44 = vld [vmem:[%s4630_s14] ss:$0 sm:$0xff] }
 0x448   :  { %3615 = vmatprep.subr.bf16.mxu0 %v4206_v7 }
 0x44b   :  { %3616 = vmatpush3.bf16.msra.mxu0 %v3880_v55 }
 0x44c   :  { %3617 = vmatprep.subr.bf16.mxu0 %v4206_v7 }
 0x44f   :  { %3618 = vmatpush3.bf16.msra.mxu0 %v3881_v39 }
 0x450   :  { %3619 = vmatprep.subr.bf16.mxu0 %v4206_v7 }
 0x453   :  { %3620 = vmatpush3.bf16.msra.mxu0 %v3882_v50 }
 0x454   :  { %3621 = vmatprep.subr.bf16.mxu0 %v4206_v7 }
 0x457   :  { %3622 = vmatpush3.bf16.msra.mxu0 %v3883_v16 }
 0x458   :  { %3647 = vmatprep.subr.bf16.mxu0 %v4206_v7 }
 0x4f9   :  { %v2266_v14 = vpop.f32.mrf.mxu0 }
 0x4fa   :  { %v2267_v53 = vadd.f32 %v3264_v52, %v2266_v14 }
 0x4fb   :  { %v3585_v22 = vpop.f32.mrf.mxu0 }
 0x4fc   :  { %v3273_v54 = vmul.f32 -1.442695, %v2267_v53 }
 0x4fd   :  { %v2269_v56 = vpop.f32.mrf.mxu0 }
 0x4fe   :  { %3916 = vpow2.f32 %v3273_v54  ;;  %v2270_v9 = vadd.f32 %v3264_v52, %v2269_v56 }
 0x4ff   :  { %v3586_v58 = vpop.f32.mrf.mxu0 }
 0x500   :  { %v3274_v62 = vmul.f32 -1.442695, %v2270_v9 }
 0x502   :  { %3918 = vpow2.f32 %v3274_v62  ;;  %v3972_v62 = vld [vmem:[#allocation2] sm:$0xff] }
 0x50b   :  { %v3917_v2 = vpop.eup %3916 }
 0x50c   :  { %v2279_v3 = vadd.f32 1.0, %v3917_v2 }
 0x50e   :  { %3920 = vrcp.f32 %v2279_v3  ;;  %v3973_v3 = vld [vmem:[#allocation2 + $0x10] sm:$0xff] }
 0x50f   :  { %v3919_v4 = vpop.eup %3918 }
 0x510   :  { %v2280_v5 = vadd.f32 1.0, %v3919_v4 }
 0x512   :  { %3922 = vrcp.f32 %v2280_v5 }
 0x51b   :  { %v3921_v6 = vpop.eup %3920 }
 0x51c   :  { %v2285_v10 = vmul.f32 %v3921_v6, %v2267_v53  ;;  %v3892_v6 = vld [vmem:[#allocation16 + $0x78] sm:$0xff]  }
 0x51f   :  { %v3923_v8 = vpop.eup %3922 }
 0x520   :  { %v2286_v11 = vmul.f32 %v3923_v8, %v2270_v9  ;;  %v3893_v8 = vld [vmem:[#allocation16 + $0x70] sm:$0xff]  }
 0x522   :  { %v2304_v19 = vpack.c.bf16 %v2286_v11, %v2285_v10  ;;  %v3894_v10 = vld [vmem:[#allocation16 + $0x68] sm:$0xff]   ;;  %v3895_v11 = vld [vmem:[#allocation16 + $0x60] sm:$0xff]  }
 0x524   :  { %3604 = vmatmul.mubr.bf16.vlgmr.msra.gmra.mxu1 %v2304_v19  ;;  %v3896_v19 = vld [vmem:[#allocation16 + $0x58] sm:$0xff]  }
 0x525   :  { %3643 = vmatprep.mubr.msk.bf16.mxu1 %vm4207_vm7, %v4206_v7  ;;  %3628 = vmatpush3.bf16.msra.mxu1 %v3884_v33  ;;  %v3907_v33 = vld [vmem:[#allocation16 + $0x80] sm:$0xff]  }
 0x526   :  { %3629 = vmatprep.subr.bf16.mxu1 %v4206_v7 }
 0x529   :  { %3630 = vmatpush3.bf16.msra.mxu1 %v3885_v21  ;;  %v3308_v21 = vld [vmem:[%s4630_s14 + $0x1] ss:$0 sm:$0xff] }
 0x52a   :  { %3631 = vmatprep.subr.bf16.mxu1 %v4206_v7 }
 0x52d   :  { %3632 = vmatpush3.bf16.msra.mxu1 %v3886_v34 }
 0x52e   :  { %3633 = vmatprep.subr.bf16.mxu1 %v4206_v7 }
 0x531   :  { %3634 = vmatpush3.bf16.msra.mxu1 %v3887_v35 }
 0x532   :  { %3635 = vmatprep.subr.bf16.mxu1 %v4206_v7 }
 0x535   :  { %3636 = vmatpush3.bf16.msra.mxu1 %v3888_v60 }
 0x536   :  { %3637 = vmatprep.subr.bf16.mxu1 %v4206_v7 }
 0x5e4   :  { %v2392_v20 = vpop.f32.mrf.mxu1 }
 0x5e5   :  { %v2393_v23 = vadd.f32 %v3275_v18, %v2392_v20 }
 0x5e6   :  { %v3605_v24 = vpop.f32.mrf.mxu1 }
 0x5e7   :  { %v3284_v25 = vmul.f32 -1.442695, %v2393_v23 }
 0x5e8   :  { %v2395_v61 = vpop.f32.mrf.mxu1 }
 0x5e9   :  { %3924 = vpow2.f32 %v3284_v25  ;;  %v2396_v26 = vadd.f32 %v3275_v18, %v2395_v61 }
 0x5ea   :  { %v3606_v17 = vpop.f32.mrf.mxu1 }
 0x5eb   :  { %v3285_v27 = vmul.f32 -1.442695, %v2396_v26 }
 0x5ed   :  { %3926 = vpow2.f32 %v3285_v27 }
 0x5f6   :  { %v3925_v28 = vpop.eup %3924 }
 0x5f7   :  { %v2405_v13 = vadd.f32 1.0, %v3925_v28 }
 0x5f9   :  { %3928 = vrcp.f32 %v2405_v13 }
 0x5fa   :  { %v3927_v29 = vpop.eup %3926 }
 0x5fb   :  { %v2406_v59 = vadd.f32 1.0, %v3927_v29 }
 0x5fd   :  { %3930 = vrcp.f32 %v2406_v59 }
 0x606   :  { %v3929_v63 = vpop.eup %3928 }
 0x607   :  { %v2411_v37 = vmul.f32 %v3929_v63, %v2393_v23  ;;  %v3900_v63 = vld [vmem:[#allocation16 + $0xb8] sm:$0xff]  }
 0x609   :  { %v2413_v30 = vadd.f32 %v2411_v37, %v4484_v38  ;;  %v3889_v38 = vld [vmem:[#allocation16 + $0x10] sm:$0xff]  }
 0x60a   :  { %v3931_v0 = vpop.eup %3930  ;;  %3638 = vmatpush3.bf16.msra.mxu1 %v3889_v38  ;;  %v3901_v37 = vld [vmem:[#allocation16 + $0xb0] sm:$0xff]  }
 0x60b   :  { %v2412_v57 = vmul.f32 %v3931_v0, %v2396_v26  ;;  %3639 = vmatprep.subr.bf16.mxu1 %v4206_v7  ;;  %v3902_v0 = vld [vmem:[#allocation16 + $0xa8] sm:$0xff]  }
 0x60d   :  { %v2414_v31 = vadd.f32 %v2412_v57, %v4487_v40  ;;  %v3890_v40 = vld [vmem:[#allocation16 + $0x8] sm:$0xff]   ;;  %v3903_v57 = vld [vmem:[#allocation16 + $0xa0] sm:$0xff]  }
 0x60e   :  { %3640 = vmatpush3.bf16.msra.mxu1 %v3890_v40 }
 0x60f   :  { %v2431_v32 = vpack.c.bf16 %v2414_v31, %v2413_v30  ;;  %3641 = vmatprep.subr.bf16.mxu1 %v4206_v7  ;;  %v3904_v30 = vld [vmem:[#allocation16 + $0x98] sm:$0xff]   ;;  %v3905_v31 = vld [vmem:[#allocation16 + $0x90] sm:$0xff]  }
 0x611   :  { %3624 = vmatmul.mubr.bf16.vlgmr.msra.gmra.mxu0 %v2431_v32  ;;  %v3906_v32 = vld [vmem:[#allocation16 + $0x88] sm:$0xff]  }
 0x612   :  { %3663 = vmatprep.mubr.msk.bf16.mxu0 %vm4207_vm7, %v4206_v7  ;;  %3642 = vmatpush3.bf16.msra.mxu1 %v3891_v41 }
 0x613   :  { %3667 = vmatprep.subr.bf16.mxu1 %v4206_v7  ;;  %3648 = vmatpush3.bf16.msra.mxu0 %v3892_v6 }
 0x614   :  { %3649 = vmatprep.subr.bf16.mxu0 %v4206_v7 }
 0x617   :  { %3650 = vmatpush3.bf16.msra.mxu0 %v3893_v8 }
 0x618   :  { %3651 = vmatprep.subr.bf16.mxu0 %v4206_v7 }
 0x61b   :  { %3652 = vmatpush3.bf16.msra.mxu0 %v3894_v10 }
 0x61c   :  { %3653 = vmatprep.subr.bf16.mxu0 %v4206_v7 }
 0x61f   :  { %3654 = vmatpush3.bf16.msra.mxu0 %v3895_v11 }
 0x620   :  { %3655 = vmatprep.subr.bf16.mxu0 %v4206_v7 }
 0x623   :  { %3656 = vmatpush3.bf16.msra.mxu0 %v3896_v19 }
 0x624   :  { %3657 = vmatprep.subr.bf16.mxu0 %v4206_v7 }
 0x627   :  { %3658 = vmatpush3.bf16.msra.mxu0 %v3897_v12 }
 0x628   :  { %3659 = vmatprep.subr.bf16.mxu0 %v4206_v7 }
 0x62b   :  { %3660 = vmatpush3.bf16.msra.mxu0 %v3898_v15 }
 0x62c   :  { %3661 = vmatprep.subr.bf16.mxu0 %v4206_v7 }
 0x62f   :  { %3662 = vmatpush3.bf16.msra.mxu0 %v3899_v1 }
 0x630   :  { %3687 = vmatprep.subr.bf16.mxu0 %v4206_v7 }
 0x6d1   :  { %v2521_v43 = vpop.f32.mrf.mxu0 }
 0x6d2   :  { %v2522_v45 = vadd.f32 %v3286_v42, %v2521_v43 }
 0x6d3   :  { %v3625_v36 = vpop.f32.mrf.mxu0 }
 0x6d4   :  { %v3295_v47 = vmul.f32 -1.442695, %v2522_v45 }
 0x6d5   :  { %v2524_v46 = vpop.f32.mrf.mxu0 }
 0x6d6   :  { %3932 = vpow2.f32 %v3295_v47  ;;  %v2525_v48 = vadd.f32 %v3286_v42, %v2524_v46 }
 0x6d7   :  { %v3626_v49 = vpop.f32.mrf.mxu0 }
 0x6d8   :  { %v3296_v51 = vmul.f32 -1.442695, %v2525_v48 }
 0x6da   :  { %3934 = vpow2.f32 %v3296_v51 }
 0x6e3   :  { %v3933_v52 = vpop.eup %3932 }
 0x6e4   :  { %v2534_v14 = vadd.f32 1.0, %v3933_v52 }
 0x6e6   :  { %3936 = vrcp.f32 %v2534_v14 }
 0x6e7   :  { %v3935_v53 = vpop.eup %3934 }
 0x6e8   :  { %v2535_v22 = vadd.f32 1.0, %v3935_v53 }
 0x6ea   :  { %3938 = vrcp.f32 %v2535_v22 }
 0x6f3   :  { %v3937_v54 = vpop.eup %3936 }
 0x6f4   :  { %v2540_v56 = vmul.f32 %v3937_v54, %v2522_v45  ;;  %v3908_v54 = vld [vmem:[#allocation16 + $0xf8] sm:$0xff]  }
 0x6f6   :  { %v4556_v2 = vadd.f32 %v3972_v62, %v2540_v56  ;;  %v3909_v56 = vld [vmem:[#allocation16 + $0xf0] sm:$0xff]   ;;  %v3912_v62 = vld [vmem:[#allocation16 + $0xd8] sm:$0xff]  }
 0x6f7   :  { %v3939_v9 = vpop.eup %3938 }
 0x6f8   :  { %v2541_v58 = vmul.f32 %v3939_v9, %v2525_v48  ;;  %v3910_v9 = vld [vmem:[#allocation16 + $0xe8] sm:$0xff]  }
 0x6fa   :  { %v4558_v4 = vadd.f32 %v3973_v3, %v2541_v58  ;;  %v3911_v58 = vld [vmem:[#allocation16 + $0xe0] sm:$0xff]   ;;  %v3914_v3 = vld [vmem:[#allocation16 + $0xc8] sm:$0xff]  }
 0x6fc   :  { %v2560_v5 = vpack.c.bf16 %v4558_v4, %v4556_v2 }
 0x6fe   :  { %3644 = vmatmul.mubr.bf16.vlgmr.msra.gmra.mxu1 %v2560_v5  ;;  %v3319_v5 = vld [vmem:[%s4630_s14 + $0x2] ss:$0 sm:$0xff] }
 0x6ff   :  { %3683 = vmatprep.mubr.msk.bf16.mxu1 %vm4207_vm7, %v4206_v7  ;;  %3668 = vmatpush3.bf16.msra.mxu1 %v3900_v63 }
 0x700   :  { %3669 = vmatprep.subr.bf16.mxu1 %v4206_v7 }
 0x703   :  { %3670 = vmatpush3.bf16.msra.mxu1 %v3901_v37 }
 0x704   :  { %3671 = vmatprep.subr.bf16.mxu1 %v4206_v7 }
 0x707   :  { %3672 = vmatpush3.bf16.msra.mxu1 %v3902_v0 }
 0x708   :  { %3673 = vmatprep.subr.bf16.mxu1 %v4206_v7 }
 0x70b   :  { %3674 = vmatpush3.bf16.msra.mxu1 %v3903_v57 }
 0x70c   :  { %3675 = vmatprep.subr.bf16.mxu1 %v4206_v7 }
 0x70f   :  { %3676 = vmatpush3.bf16.msra.mxu1 %v3904_v30 }
 0x710   :  { %3677 = vmatprep.subr.bf16.mxu1 %v4206_v7 }
 0x713   :  { %3678 = vmatpush3.bf16.msra.mxu1 %v3905_v31 }
 0x714   :  { %3679 = vmatprep.subr.bf16.mxu1 %v4206_v7 }
 0x717   :  { %3680 = vmatpush3.bf16.msra.mxu1 %v3906_v32 }
 0x718   :  { %3681 = vmatprep.subr.bf16.mxu1 %v4206_v7 }
 0x71b   :  { %3682 = vmatpush3.bf16.msra.mxu1 %v3907_v33 }
 0x7be   :  { %v2648_v55 = vpop.f32.mrf.mxu1 }
 0x7bf   :  { %v2649_v39 = vadd.f32 %v3297_v44, %v2648_v55 }
 0x7c0   :  { %v3645_v50 = vpop.f32.mrf.mxu1 }
 0x7c1   :  { %v3306_v16 = vmul.f32 -1.442695, %v2649_v39 }
 0x7c2   :  { %v2651_v18 = vpop.f32.mrf.mxu1 }
 0x7c3   :  { %3940 = vpow2.f32 %v3306_v16  ;;  %v2652_v20 = vadd.f32 %v3297_v44, %v2651_v18 }
 0x7c4   :  { %v3646_v23 = vpop.f32.mrf.mxu1 }
 0x7c5   :  { %v3307_v24 = vmul.f32 -1.442695, %v2652_v20 }
 0x7c7   :  { %3942 = vpow2.f32 %v3307_v24  ;;  %v3330_v24 = vld [vmem:[%s4630_s14 + $0x3] ss:$0 sm:$0xff]  ;;  %s4208_s14 = smov [#allocation17]  }
 0x7c8   :  { %s3058_s1 = sshll.u32 %s4208_s14, 4  ;;  %s3059_s1 = int_to_ptr.vmem [resolvable:$true] %s3058_s1 }
 0x7c9   :  { %s4154_s19 = scalar_lea.vmem %s3059_s1, 256  ;;  %p4159_p4 = scmp.lt.s32.totalorder %s3059_s1, %s3059_s1 }
 0x7ca   :  { %p4155_p3 = scmp.ne.s32.totalorder %s3059_s1, %s4154_s19  ;;  %p4160_p5 = scmp.lt.s32.totalorder %s4154_s19, %s4154_s19 }
 0x7cc   :  { %p4161_p6 = por %p4160_p5, %p4159_p4 }
 0x7ce   :  { %p4162_p7 = pnand %p4161_p6, %p4155_p3 }
 0x7d0   :  { %v3941_v25 = vpop.eup %3940 }
 0x7d1   :  { %v2661_v61 = vadd.f32 1.0, %v3941_v25 }
 0x7d3   :  { %3944 = vrcp.f32 %v2661_v61 }
 0x7d4   :  { %v3943_v26 = vpop.eup %3942 }
 0x7d5   :  { %v2662_v17 = vadd.f32 1.0, %v3943_v26 }
 0x7d7   :  { %3946 = vrcp.f32 %v2662_v17 }
 0x7e0   :  { %v3945_v27 = vpop.eup %3944 }
 0x7e1   :  { %v2667_v13 = vmul.f32 %v3945_v27, %v2649_v39 }
 0x7e4   :  { %v3947_v28 = vpop.eup %3946 }
 0x7e5   :  { %v2668_v29 = vmul.f32 %v3947_v28, %v2652_v20 }
 0x7e7   :  { %v2686_v59 = vpack.c.bf16 %v2668_v29, %v2667_v13 }
 0x7e9   :  { %3664 = vmatmul.mubr.bf16.vlgmr.msra.gmra.mxu0 %v2686_v59 }
 0x7ea   :  { %3703 = vmatprep.mubr.msk.bf16.mxu0 %vm4207_vm7, %v4206_v7  ;;  %3688 = vmatpush3.bf16.msra.mxu0 %v3908_v54 }
 0x7eb   :  { %3689 = vmatprep.subr.bf16.mxu0 %v4206_v7 }
 0x7ee   :  { %3690 = vmatpush3.bf16.msra.mxu0 %v3909_v56 }
 0x7ef   :  { %3691 = vmatprep.subr.bf16.mxu0 %v4206_v7 }
 0x7f2   :  { %3692 = vmatpush3.bf16.msra.mxu0 %v3910_v9 }
 0x7f3   :  { %3693 = vmatprep.subr.bf16.mxu0 %v4206_v7 }
 0x7f6   :  { %3694 = vmatpush3.bf16.msra.mxu0 %v3911_v58 }
 0x7f7   :  { %3695 = vmatprep.subr.bf16.mxu0 %v4206_v7 }
 0x7fa   :  { %3696 = vmatpush3.bf16.msra.mxu0 %v3912_v62 }
 0x7fb   :  { %3697 = vmatprep.subr.bf16.mxu0 %v4206_v7 }
 0x8a9   :  { %v2774_v34 = vpop.f32.mrf.mxu0 }
 0x8aa   :  { %v2775_v35 = vadd.f32 %v3308_v21, %v2774_v34 }
 0x8ab   :  { %v3665_v60 = vpop.f32.mrf.mxu0 }
 0x8ac   :  { %v3317_v38 = vmul.f32 -1.442695, %v2775_v35 }
 0x8ad   :  { %v2777_v40 = vpop.f32.mrf.mxu0 }
 0x8ae   :  { %3948 = vpow2.f32 %v3317_v38  ;;  %v2778_v41 = vadd.f32 %v3308_v21, %v2777_v40 }
 0x8af   :  { %v3666_v42 = vpop.f32.mrf.mxu0 }
 0x8b0   :  { %v3318_v43 = vmul.f32 -1.442695, %v2778_v41 }
 0x8b2   :  { %3950 = vpow2.f32 %v3318_v43 }
 0x8bb   :  { %v3949_v45 = vpop.eup %3948 }
 0x8bc   :  { %v2787_v36 = vadd.f32 1.0, %v3949_v45 }
 0x8be   :  { %3952 = vrcp.f32 %v2787_v36 }
 0x8bf   :  { %v3951_v47 = vpop.eup %3950 }
 0x8c0   :  { %v2788_v46 = vadd.f32 1.0, %v3951_v47 }
 0x8c2   :  { %3954 = vrcp.f32 %v2788_v46 }
 0x8cb   :  { %v3953_v48 = vpop.eup %3952 }
 0x8cc   :  { %v2793_v49 = vmul.f32 %v3953_v48, %v2775_v35 }
 0x8ce   :  { %v4588_v14 = vadd.f32 %v2793_v49, %v4556_v2  ;;  %v3913_v2 = vld [vmem:[#allocation16 + $0xd0] sm:$0xff]  }
 0x8cf   :  { %v3955_v51 = vpop.eup %3954  ;;  %3698 = vmatpush3.bf16.msra.mxu0 %v3913_v2 }
 0x8d0   :  { %v2794_v52 = vmul.f32 %v3955_v51, %v2778_v41  ;;  %3699 = vmatprep.subr.bf16.mxu0 %v4206_v7 }
 0x8d2   :  { %v4591_v53 = vadd.f32 %v2794_v52, %v4558_v4  ;;  %v3915_v4 = vld [vmem:[#allocation16 + $0xc0] sm:$0xff]  }
 0x8d3   :  { %3700 = vmatpush3.bf16.msra.mxu0 %v3914_v3 }
 0x8d4   :  { %v2814_v22 = vpack.c.bf16 %v4591_v53, %v4588_v14  ;;  %3701 = vmatprep.subr.bf16.mxu0 %v4206_v7 }
 0x8d6   :  { %3684 = vmatmul.mubr.bf16.vlgmr.msra.gmra.mxu1 %v2814_v22 }
 0x8d7   :  { %3702 = vmatpush3.bf16.msra.mxu0 %v3915_v4 }
 0x996   :  { %v2902_v6 = vpop.f32.mrf.mxu1 }
 0x997   :  { %v2903_v8 = vadd.f32 %v3319_v5, %v2902_v6 }
 0x998   :  { %v3685_v10 = vpop.f32.mrf.mxu1 }
 0x999   :  { %v3328_v11 = vmul.f32 -1.442695, %v2903_v8 }
 0x99a   :  { %v2905_v19 = vpop.f32.mrf.mxu1 }
 0x99b   :  { %3956 = vpow2.f32 %v3328_v11  ;;  %v2906_v12 = vadd.f32 %v3319_v5, %v2905_v19 }
 0x99c   :  { %v3686_v15 = vpop.f32.mrf.mxu1 }
 0x99d   :  { %v3329_v1 = vmul.f32 -1.442695, %v2906_v12 }
 0x99f   :  { %3958 = vpow2.f32 %v3329_v1 }
 0x9a8   :  { %v3957_v44 = vpop.eup %3956 }
 0x9a9   :  { %v2915_v55 = vadd.f32 1.0, %v3957_v44 }
 0x9ab   :  { %3960 = vrcp.f32 %v2915_v55 }
 0x9ac   :  { %v3959_v39 = vpop.eup %3958 }
 0x9ad   :  { %v2916_v7 = vadd.f32 1.0, %v3959_v39 }
 0x9af   :  { %3962 = vrcp.f32 %v2916_v7 }
 0x9b8   :  { %v3961_v50 = vpop.eup %3960 }
 0x9b9   :  { %v2921_v18 = vmul.f32 %v3961_v50, %v2903_v8 }
 0x9bc   :  { %v3963_v16 = vpop.eup %3962 }
 0x9bd   :  { %v2922_v20 = vmul.f32 %v3963_v16, %v2906_v12 }
 0x9bf   :  { %v2940_v23 = vpack.c.bf16 %v2922_v20, %v2921_v18 }
 0x9c1   :  { %3704 = vmatmul.mubr.bf16.vlgmr.msra.gmra.mxu0 %v2940_v23 }
 0xa81   :  { %v3028_v25 = vpop.f32.mrf.mxu0 }
 0xa82   :  { %v3029_v61 = vadd.f32 %v3330_v24, %v3028_v25 }
 0xa83   :  { %v3705_v26 = vpop.f32.mrf.mxu0 }
 0xa84   :  { %v3339_v17 = vmul.f32 -1.442695, %v3029_v61 }
 0xa85   :  { %v3031_v27 = vpop.f32.mrf.mxu0 }
 0xa86   :  { %3964 = vpow2.f32 %v3339_v17  ;;  %v3032_v28 = vadd.f32 %v3330_v24, %v3031_v27 }
 0xa87   :  { %v3706_v13 = vpop.f32.mrf.mxu0 }
 0xa88   :  { %v3340_v29 = vmul.f32 -1.442695, %v3032_v28 }
 0xa8a   :  { %3966 = vpow2.f32 %v3340_v29 }
 0xa93   :  { %v3965_v59 = vpop.eup %3964 }
 0xa94   :  { %v3041_v63 = vadd.f32 1.0, %v3965_v59 }
 0xa96   :  { %3968 = vrcp.f32 %v3041_v63 }
 0xa97   :  { %v3967_v37 = vpop.eup %3966 }
 0xa98   :  { %v3042_v0 = vadd.f32 1.0, %v3967_v37 }
 0xa9a   :  { %3970 = vrcp.f32 %v3042_v0 }
 0xaa3   :  { %v3969_v57 = vpop.eup %3968 }
 0xaa4   :  { %v3047_v30 = vmul.f32 %v3969_v57, %v3029_v61 }
 0xaa6   :  { %v3049_v31 = vadd.f32 %v3047_v30, %v4588_v14 }
 0xaa7   :  { %v3971_v32 = vpop.eup %3970 }
 0xaa8   :  { %3051 = vst [vmem:[#allocation17] sm:$0xff] %v3049_v31  ;;  %v3048_v33 = vmul.f32 %v3971_v32, %v3032_v28 }
 0xaaa   :  { %v3050_v21 = vadd.f32 %v3048_v33, %v4591_v53 }
 0xaac   :  { %3052 = vst [vmem:[#allocation17 + $0x8] sm:$0xff] %v3050_v21 }
 0xaad   :  { %4165 = shalt.err (!%p4162_p7)
}
 0xaae   :  { %3064 = dma.vmem_to_hbm [thread:$0]  %s3059_s1, 256, %s4631_s15, [#allocation4], %s4187_s21, %s4187_s21, %s4188_s22  }
 0xaaf   :  { %4184 = dma.done.wait [#allocation4], 256  }
 0xab0   :  { %4185 = vsyncadd [#allocation4], 4294967040 }
 0xab1   :  { %3068 = vsyncpa [#allocation3], 1 }
 0xab2   :  { %3069 = vsyncpa [#allocation6], 1 }
 0xab3   :  { %3070 = vsyncpa [#allocation9], 1 }
 0xab4   :  { %3071 = vsyncpa [#allocation12], 1 }
 0xab5   :  { %3072 = vsyncpa [#allocation15], 1 }
 0xab6   :  { %3073 = vsyncpa [#allocation4], 1 }

</bundles_post_ra>
